<compile_context>
chip_gen: v7x
topology: tpu7x:2x2x1
jax: 0.10.0
libtpu: 0.0.40
codegen_flags: <defaults>
</compile_context>

<pallas_src>
import functools

import jax
import jax.numpy as jnp
from jax import lax
from jax.experimental import pallas as pl
from jax.experimental.pallas import tpu as pltpu


def _layer_norm(x, gamma, beta, eps):
    # x: (R, D); gamma/beta: (1, D); all f32
    mean = jnp.mean(x, axis=-1, keepdims=True)
    var = jnp.mean((x - mean) ** 2, axis=-1, keepdims=True)
    return (x - mean) * lax.rsqrt(var + eps) * gamma + beta


def encoder_layer_kernel(
    x_ref, wqkv_ref, wfc_ref,
    g_attn_ref, b_attn_ref, g_ln1_ref, b_ln1_ref,
    w1_ref, b1_ref, w2_ref, b2_ref,
    g_ln2_ref, b_ln2_ref,
    out_ref,
    *, n_heads, d_key, d_value,
):
    H, dk, dv = n_heads, d_key, d_value
    CB, S, D = x_ref.shape               # batch chunk handled by this grid step
    R = CB * S
    HDK = H * dk
    HDV = H * dv
    f32 = jnp.float32
    bf16 = jnp.bfloat16

    x3 = x_ref[...].astype(f32)          # (CB, S, D) residual path in f32
    x2 = x3.reshape(R, D)

    # ---- fused Q/K/V projection (Wq pre-scaled by 1/sqrt(d_key) in the wrapper) ----
    qkv = jnp.dot(x2.astype(bf16), wqkv_ref[...],
                  preferred_element_type=f32)                    # (R, 2*HDK+HDV)
    q = qkv[:, :HDK].reshape(CB, S, HDK)
    k = qkv[:, HDK:2 * HDK].reshape(CB, S, HDK)
    v = qkv[:, 2 * HDK:].reshape(CB, S, HDV)

    # ---- batched per-head attention (unrolled over the small static head count) ----
    head_outs = []
    for h in range(H):
        qh = q[:, :, h * dk:(h + 1) * dk].astype(bf16)           # (CB, S, dk)
        kh = k[:, :, h * dk:(h + 1) * dk].astype(bf16)
        vh = v[:, :, h * dv:(h + 1) * dv].astype(bf16)
        s = jnp.einsum("bqd,bkd->bqk", qh, kh,
                       preferred_element_type=f32)               # (CB, S, S)
        m = jnp.max(s, axis=-1, keepdims=True)                   # per-(batch,row,head) max
        p = jnp.exp(s - m)
        denom = jnp.sum(p, axis=-1, keepdims=True)               # lane reduce (>= 1, safe)
        oh = jnp.einsum("bqk,bkd->bqd", p.astype(bf16), vh,
                        preferred_element_type=f32)              # (CB, S, dv)
        head_outs.append(oh * pl.reciprocal(denom, approx=True))
    attn = jnp.concatenate(head_outs, axis=-1).reshape(R, HDV)   # heads concatenated

    # ---- output projection + residual + attention LayerNorm (eps = 1e-6) ----
    fc = jnp.dot(attn.astype(bf16), wfc_ref[...], preferred_element_type=f32)
    # TODO(synk): nn.Dropout layers are identity here (inference semantics).
    attn_out = _layer_norm(x2 + fc, g_attn_ref[...], b_attn_ref[...], 1e-6)

    # ---- EncoderLayer: residual + layernorm1 (eps = 1e-5) ----
    y = _layer_norm(x2 + attn_out, g_ln1_ref[...], b_ln1_ref[...], 1e-5)

    # ---- FFN: Linear -> ReLU -> Linear ----
    h1 = jnp.dot(y.astype(bf16), w1_ref[...], preferred_element_type=f32) + b1_ref[...]
    h1 = jnp.maximum(h1, 0.0)
    ffn = jnp.dot(h1.astype(bf16), w2_ref[...], preferred_element_type=f32) + b2_ref[...]

    # ---- residual + layernorm2 (eps = 1e-5) ----
    z = _layer_norm(y + ffn, g_ln2_ref[...], b_ln2_ref[...], 1e-5)
    out_ref[...] = z.reshape(CB, S, D).astype(out_ref.dtype)


def _pick_batch_block(B, S, target_rows=512):
    """Batch elements per grid step: keep blocks <= ~512 rows and prefer >= 2 grid steps
    (so the parallel axis can shard across both TensorCores on v7x)."""
    divisors = [d for d in range(1, B + 1) if B % d == 0]
    cands = [d for d in divisors if d * S <= target_rows and B // d >= 2]
    if cands:
        return max(cands)
    cands = [d for d in divisors if d * S <= target_rows]
    if cands:
        return max(cands)
    return 1


def encoder_layer(x, params, *, n_heads, d_key, d_value, batch_block=None):
    """EncoderLayer forward.  `batch_block` = batch elements per grid step (auto-picked if
    None); the batch-chunk grid axis is 'parallel' so it shards across TensorCores."""
    B, S, D = x.shape
    HDK = n_heads * d_key
    HDV = n_heads * d_value
    assert HDV == D, "module requires n_heads * d_value == d_model"
    d_ff = params["w1"].shape[1]
    f32 = jnp.float32

    if batch_block is None:
        batch_block = _pick_batch_block(B, S)
    assert B % batch_block == 0, "batch_block must divide batch"
    CB = batch_block
    G = B // CB

    # Host-side packing: fold 1/sqrt(d_key) into Wq, fuse [Wq|Wk|Wv], cast MXU weights to bf16.
    scale = 1.0 / (d_key ** 0.5)
    wqkv = jnp.concatenate(
        [params["wq"] * scale, params["wk"], params["wv"]], axis=1
    ).astype(jnp.bfloat16)
    wfc = params["wfc"].astype(jnp.bfloat16)
    w1 = params["w1"].astype(jnp.bfloat16)
    w2 = params["w2"].astype(jnp.bfloat16)

    kernel = functools.partial(
        encoder_layer_kernel, n_heads=n_heads, d_key=d_key, d_value=d_value)

    def make_call(weight_buffering):
        def const_spec(shape):
            if weight_buffering is None:
                return pl.BlockSpec(shape, lambda g: (0, 0))
            # grid-invariant operand: single-buffer it (double-buffering a constant block is
            # pure VMEM waste at realistic D/d_ff against v7x's 64 MiB).
            return pl.BlockSpec(shape, lambda g: (0, 0), pipeline_mode=weight_buffering)

        return pl.pallas_call(
            kernel,
            out_shape=jax.ShapeDtypeStruct((B, S, D), x.dtype),
            grid=(G,),
            in_specs=[
                pl.BlockSpec((CB, S, D), lambda g: (g, 0, 0)),   # activation batch chunk
                const_spec((D, 2 * HDK + HDV)),                  # fused QKV weight (bf16)
                const_spec((HDV, D)),                            # fc weight (bf16)
                const_spec((1, D)), const_spec((1, D)),          # attention LayerNorm gamma/beta
                const_spec((1, D)), const_spec((1, D)),          # layernorm1 gamma/beta
                const_spec((D, d_ff)), const_spec((1, d_ff)),    # ffn linear1 (bf16 W, f32 b)
                const_spec((d_ff, D)), const_spec((1, D)),       # ffn linear2 (bf16 W, f32 b)
                const_spec((1, D)), const_spec((1, D)),          # layernorm2 gamma/beta
            ],
            out_specs=pl.BlockSpec((CB, S, D), lambda g: (g, 0, 0)),
            compiler_params=pltpu.CompilerParams(
                dimension_semantics=("parallel",),
                vmem_limit_bytes=48 * 1024 * 1024),
        )

    args = (
        x, wqkv, wfc,
        params["g_attn"].astype(f32), params["b_attn"].astype(f32),
        params["g_ln1"].astype(f32), params["b_ln1"].astype(f32),
        w1, params["b1"].astype(f32), w2, params["b2"].astype(f32),
        params["g_ln2"].astype(f32), params["b_ln2"].astype(f32),
    )
    try:
        return make_call(pl.Buffered(1))(*args)
    except Exception:
        # TODO(synk): single-buffered constant operands not supported on this jax version;
        # fall back to default (double-buffered) constant blocks -- same results.
        return make_call(None)(*args)


def encoder_layer_ref(x, p, *, n_heads, d_key, d_value, matmul_dtype=jnp.float32):
    """Pure-JAX reference mirroring the PyTorch forward (eval mode).
    With matmul_dtype=bfloat16 it mirrors the kernel's mixed precision."""
    B, S, D = x.shape
    H, dk, dv = n_heads, d_key, d_value
    md = matmul_dtype

    def ln(v, g, b, eps):
        m = jnp.mean(v, axis=-1, keepdims=True)
        var = jnp.mean((v - m) ** 2, axis=-1, keepdims=True)
        return (v - m) / jnp.sqrt(var + eps) * g + b

    def mm(a, w):
        return jnp.dot(a.astype(md), w.astype(md), preferred_element_type=jnp.float32)

    q = mm(x, p["wq"]).reshape(B, S, H, dk).transpose(0, 2, 1, 3)
    k = mm(x, p["wk"]).reshape(B, S, H, dk).transpose(0, 2, 1, 3)
    v = mm(x, p["wv"]).reshape(B, S, H, dv).transpose(0, 2, 1, 3)
    s = jnp.einsum("bhqd,bhkd->bhqk", q.astype(md), k.astype(md),
                   preferred_element_type=jnp.float32) / (dk ** 0.5)
    a = jax.nn.softmax(s, axis=-1)
    o = jnp.einsum("bhqk,bhkd->bhqd", a.astype(md), v.astype(md),
                   preferred_element_type=jnp.float32)
    o = o.transpose(0, 2, 1, 3).reshape(B, S, H * dv)
    o = mm(o, p["wfc"])
    attn_out = ln(x + o, p["g_attn"][0], p["b_attn"][0], 1e-6)
    y = ln(x + attn_out, p["g_ln1"][0], p["b_ln1"][0], 1e-5)
    ffn = mm(jnp.maximum(mm(y, p["w1"]) + p["b1"][0], 0.0), p["w2"]) + p["b2"][0]
    return ln(y + ffn, p["g_ln2"][0], p["b_ln2"][0], 1e-5)


if __name__ == "__main__":
    # Small shapes consistent with the module (n_heads * d_value must equal d_model).
    B, S, D = 2, 8, 32
    H, DK, DV = 4, 8, 8
    DFF = 64

    key = jax.random.PRNGKey(0)
    ks = jax.random.split(key, 9)
    sc = 0.1
    params = {
        "wq": sc * jax.random.normal(ks[0], (D, H * DK), jnp.float32),
        "wk": sc * jax.random.normal(ks[1], (D, H * DK), jnp.float32),
        "wv": sc * jax.random.normal(ks[2], (D, H * DV), jnp.float32),
        "wfc": sc * jax.random.normal(ks[3], (H * DV, D), jnp.float32),
        "g_attn": jnp.ones((1, D), jnp.float32),
        "b_attn": jnp.zeros((1, D), jnp.float32),
        "g_ln1": jnp.ones((1, D), jnp.float32),
        "b_ln1": jnp.zeros((1, D), jnp.float32),
        "w1": sc * jax.random.normal(ks[4], (D, DFF), jnp.float32),
        "b1": sc * jax.random.normal(ks[5], (1, DFF), jnp.float32),
        "w2": sc * jax.random.normal(ks[6], (DFF, D), jnp.float32),
        "b2": sc * jax.random.normal(ks[7], (1, D), jnp.float32),
        "g_ln2": jnp.ones((1, D), jnp.float32),
        "b_ln2": jnp.zeros((1, D), jnp.float32),
    }
    x = jax.random.normal(ks[8], (B, S, D), jnp.float32)

    out = encoder_layer(x, params, n_heads=H, d_key=DK, d_value=DV)
    out = jax.block_until_ready(out)
    assert out.shape == (B, S, D)
    assert bool(jnp.all(jnp.isfinite(out)))

    # Tight check vs a reference mirroring the kernel's precision (bf16 MXU / f32 accum).
    ref_b = encoder_layer_ref(x, params, n_heads=H, d_key=DK, d_value=DV,
                              matmul_dtype=jnp.bfloat16)
    assert jnp.allclose(out, ref_b, atol=1e-2, rtol=1e-2), "mismatch vs bf16-matched reference"

    # Looser check vs exact f32 module semantics (bf16 MXU operands add ~1e-2 noise).
    ref_f = encoder_layer_ref(x, params, n_heads=H, d_key=DK, d_value=DV)
    assert jnp.allclose(out, ref_f, atol=5e-2, rtol=5e-2), "mismatch vs f32 reference"

    print("KERNEL_OK")
</pallas_src>

<mosaic_0001>
module attributes {stable_mosaic.version = 11 : i64} {
  func.func @encoder_layer_kernel(%arg0: i32, %arg1: memref<1x8x32xf32, #tpu.memory_space<vmem>>, %arg2: memref<32x96xbf16, #tpu.memory_space<vmem>>, %arg3: memref<32x32xbf16, #tpu.memory_space<vmem>>, %arg4: memref<1x32xf32, #tpu.memory_space<vmem>>, %arg5: memref<1x32xf32, #tpu.memory_space<vmem>>, %arg6: memref<1x32xf32, #tpu.memory_space<vmem>>, %arg7: memref<1x32xf32, #tpu.memory_space<vmem>>, %arg8: memref<32x64xbf16, #tpu.memory_space<vmem>>, %arg9: memref<1x64xf32, #tpu.memory_space<vmem>>, %arg10: memref<64x32xbf16, #tpu.memory_space<vmem>>, %arg11: memref<1x32xf32, #tpu.memory_space<vmem>>, %arg12: memref<1x32xf32, #tpu.memory_space<vmem>>, %arg13: memref<1x32xf32, #tpu.memory_space<vmem>>, %arg14: memref<1x8x32xf32, #tpu.memory_space<vmem>>) attributes {dimension_semantics = [#tpu.dimension_semantics<parallel>], iteration_bounds = array<i64: 2>, scalar_prefetch = 0 : i64, scratch_operands = 0 : i64, tpu.core_type = #tpu.core_type<tc>, window_params = [{transform_indices = @transform_0, window_bounds = array<i64: 1, 8, 32>}, {pipeline_mode = #tpu.pipeline_mode<synchronous>, transform_indices = @transform_1, window_bounds = array<i64: 32, 96>}, {pipeline_mode = #tpu.pipeline_mode<synchronous>, transform_indices = @transform_2, window_bounds = array<i64: 32, 32>}, {pipeline_mode = #tpu.pipeline_mode<synchronous>, transform_indices = @transform_3, window_bounds = array<i64: 1, 32>}, {pipeline_mode = #tpu.pipeline_mode<synchronous>, transform_indices = @transform_4, window_bounds = array<i64: 1, 32>}, {pipeline_mode = #tpu.pipeline_mode<synchronous>, transform_indices = @transform_5, window_bounds = array<i64: 1, 32>}, {pipeline_mode = #tpu.pipeline_mode<synchronous>, transform_indices = @transform_6, window_bounds = array<i64: 1, 32>}, {pipeline_mode = #tpu.pipeline_mode<synchronous>, transform_indices = @transform_7, window_bounds = array<i64: 32, 64>}, {pipeline_mode = #tpu.pipeline_mode<synchronous>, transform_indices = @transform_8, window_bounds = array<i64: 1, 64>}, {pipeline_mode = #tpu.pipeline_mode<synchronous>, transform_indices = @transform_9, window_bounds = array<i64: 64, 32>}, {pipeline_mode = #tpu.pipeline_mode<synchronous>, transform_indices = @transform_10, window_bounds = array<i64: 1, 32>}, {pipeline_mode = #tpu.pipeline_mode<synchronous>, transform_indices = @transform_11, window_bounds = array<i64: 1, 32>}, {pipeline_mode = #tpu.pipeline_mode<synchronous>, transform_indices = @transform_12, window_bounds = array<i64: 1, 32>}, {transform_indices = @transform_13, window_bounds = array<i64: 1, 8, 32>}]} {
    %c0 = arith.constant 0 : index
    %c0_0 = arith.constant 0 : index
    %c0_1 = arith.constant 0 : index
    %0 = vector.load %arg1[%c0, %c0_0, %c0_1] : memref<1x8x32xf32, #tpu.memory_space<vmem>>, vector<1x8x32xf32>
    %1 = vector.shape_cast %0 : vector<1x8x32xf32> to vector<8x32xf32>
    %2 = arith.truncf %1 : vector<8x32xf32> to vector<8x32xbf16>
    %c0_2 = arith.constant 0 : index
    %c0_3 = arith.constant 0 : index
    %3 = vector.load %arg2[%c0_2, %c0_3] : memref<32x96xbf16, #tpu.memory_space<vmem>>, vector<32x96xbf16>
    %cst = arith.constant dense<0.000000e+00> : vector<8x96xf32>
    %4 = tpu.matmul %2, %3, %cst {dimension_numbers = #tpu.dot_dimension_numbers<[1], [0], [0], [1], [0, 0, 1, 1], [], []>} : vector<8x32xbf16>, vector<32x96xbf16>, vector<8x96xf32> -> vector<8x96xf32>
    %5 = vector.extract_strided_slice %4 {offsets = [0, 0], sizes = [8, 32], strides = [1, 1]} : vector<8x96xf32> to vector<8x32xf32>
    %6 = vector.shape_cast %5 : vector<8x32xf32> to vector<1x8x32xf32>
    %7 = vector.extract_strided_slice %4 {offsets = [0, 32], sizes = [8, 32], strides = [1, 1]} : vector<8x96xf32> to vector<8x32xf32>
    %8 = vector.shape_cast %7 : vector<8x32xf32> to vector<1x8x32xf32>
    %9 = vector.extract_strided_slice %4 {offsets = [0, 64], sizes = [8, 32], strides = [1, 1]} : vector<8x96xf32> to vector<8x32xf32>
    %10 = vector.shape_cast %9 : vector<8x32xf32> to vector<1x8x32xf32>
    %11 = vector.extract_strided_slice %6 {offsets = [0, 0, 0], sizes = [1, 8, 8], strides = [1, 1, 1]} : vector<1x8x32xf32> to vector<1x8x8xf32>
    %12 = arith.truncf %11 : vector<1x8x8xf32> to vector<1x8x8xbf16>
    %13 = vector.extract_strided_slice %8 {offsets = [0, 0, 0], sizes = [1, 8, 8], strides = [1, 1, 1]} : vector<1x8x32xf32> to vector<1x8x8xf32>
    %14 = arith.truncf %13 : vector<1x8x8xf32> to vector<1x8x8xbf16>
    %15 = vector.extract_strided_slice %10 {offsets = [0, 0, 0], sizes = [1, 8, 8], strides = [1, 1, 1]} : vector<1x8x32xf32> to vector<1x8x8xf32>
    %16 = arith.truncf %15 : vector<1x8x8xf32> to vector<1x8x8xbf16>
    "tpu.trace_start"() <{level = 10 : i32, message = "bqd,bkd->bqk"}> : () -> ()
    %cst_4 = arith.constant dense<0.000000e+00> : vector<1x8x8xf32>
    %17 = tpu.matmul %12, %14, %cst_4 {dimension_numbers = #tpu.dot_dimension_numbers<[2], [2], [1], [1], [0, 0, 0, 1, 1, 1], [0], [0]>} : vector<1x8x8xbf16>, vector<1x8x8xbf16>, vector<1x8x8xf32> -> vector<1x8x8xf32>
    "tpu.trace_stop"() : () -> ()
    %cst_5 = arith.constant dense<0xFF800000> : vector<1x8xf32>
    %18 = vector.multi_reduction <maximumf>, %17, %cst_5 [2] : vector<1x8x8xf32> to vector<1x8xf32>
    %19 = vector.shape_cast %18 : vector<1x8xf32> to vector<1x8x1xf32>
    %20 = vector.broadcast %19 : vector<1x8x1xf32> to vector<1x8x8xf32>
    %21 = arith.subf %17, %20 : vector<1x8x8xf32>
    %22 = math.exp %21 : vector<1x8x8xf32>
    %cst_6 = arith.constant dense<0.000000e+00> : vector<1x8xf32>
    %23 = vector.multi_reduction <add>, %22, %cst_6 [2] : vector<1x8x8xf32> to vector<1x8xf32>
    %24 = vector.shape_cast %23 : vector<1x8xf32> to vector<1x8x1xf32>
    %25 = arith.truncf %22 : vector<1x8x8xf32> to vector<1x8x8xbf16>
    "tpu.trace_start"() <{level = 10 : i32, message = "bqk,bkd->bqd"}> : () -> ()
    %cst_7 = arith.constant dense<0.000000e+00> : vector<1x8x8xf32>
    %26 = tpu.matmul %25, %16, %cst_7 {dimension_numbers = #tpu.dot_dimension_numbers<[2], [1], [1], [2], [0, 0, 0, 1, 1, 2], [0], [0]>} : vector<1x8x8xbf16>, vector<1x8x8xbf16>, vector<1x8x8xf32> -> vector<1x8x8xf32>
    "tpu.trace_stop"() : () -> ()
    %27 = tpu.reciprocal %24 {approx = true} : vector<1x8x1xf32> -> vector<1x8x1xf32>
    %28 = vector.broadcast %27 : vector<1x8x1xf32> to vector<1x8x8xf32>
    %29 = arith.mulf %26, %28 : vector<1x8x8xf32>
    %30 = vector.extract_strided_slice %6 {offsets = [0, 0, 8], sizes = [1, 8, 8], strides = [1, 1, 1]} : vector<1x8x32xf32> to vector<1x8x8xf32>
    %31 = arith.truncf %30 : vector<1x8x8xf32> to vector<1x8x8xbf16>
    %32 = vector.extract_strided_slice %8 {offsets = [0, 0, 8], sizes = [1, 8, 8], strides = [1, 1, 1]} : vector<1x8x32xf32> to vector<1x8x8xf32>
    %33 = arith.truncf %32 : vector<1x8x8xf32> to vector<1x8x8xbf16>
    %34 = vector.extract_strided_slice %10 {offsets = [0, 0, 8], sizes = [1, 8, 8], strides = [1, 1, 1]} : vector<1x8x32xf32> to vector<1x8x8xf32>
    %35 = arith.truncf %34 : vector<1x8x8xf32> to vector<1x8x8xbf16>
    "tpu.trace_start"() <{level = 10 : i32, message = "bqd,bkd->bqk"}> : () -> ()
    %cst_8 = arith.constant dense<0.000000e+00> : vector<1x8x8xf32>
    %36 = tpu.matmul %31, %33, %cst_8 {dimension_numbers = #tpu.dot_dimension_numbers<[2], [2], [1], [1], [0, 0, 0, 1, 1, 1], [0], [0]>} : vector<1x8x8xbf16>, vector<1x8x8xbf16>, vector<1x8x8xf32> -> vector<1x8x8xf32>
    "tpu.trace_stop"() : () -> ()
    %cst_9 = arith.constant dense<0xFF800000> : vector<1x8xf32>
    %37 = vector.multi_reduction <maximumf>, %36, %cst_9 [2] : vector<1x8x8xf32> to vector<1x8xf32>
    %38 = vector.shape_cast %37 : vector<1x8xf32> to vector<1x8x1xf32>
    %39 = vector.broadcast %38 : vector<1x8x1xf32> to vector<1x8x8xf32>
    %40 = arith.subf %36, %39 : vector<1x8x8xf32>
    %41 = math.exp %40 : vector<1x8x8xf32>
    %cst_10 = arith.constant dense<0.000000e+00> : vector<1x8xf32>
    %42 = vector.multi_reduction <add>, %41, %cst_10 [2] : vector<1x8x8xf32> to vector<1x8xf32>
    %43 = vector.shape_cast %42 : vector<1x8xf32> to vector<1x8x1xf32>
    %44 = arith.truncf %41 : vector<1x8x8xf32> to vector<1x8x8xbf16>
    "tpu.trace_start"() <{level = 10 : i32, message = "bqk,bkd->bqd"}> : () -> ()
    %cst_11 = arith.constant dense<0.000000e+00> : vector<1x8x8xf32>
    %45 = tpu.matmul %44, %35, %cst_11 {dimension_numbers = #tpu.dot_dimension_numbers<[2], [1], [1], [2], [0, 0, 0, 1, 1, 2], [0], [0]>} : vector<1x8x8xbf16>, vector<1x8x8xbf16>, vector<1x8x8xf32> -> vector<1x8x8xf32>
    "tpu.trace_stop"() : () -> ()
    %46 = tpu.reciprocal %43 {approx = true} : vector<1x8x1xf32> -> vector<1x8x1xf32>
    %47 = vector.broadcast %46 : vector<1x8x1xf32> to vector<1x8x8xf32>
    %48 = arith.mulf %45, %47 : vector<1x8x8xf32>
    %49 = vector.extract_strided_slice %6 {offsets = [0, 0, 16], sizes = [1, 8, 8], strides = [1, 1, 1]} : vector<1x8x32xf32> to vector<1x8x8xf32>
    %50 = arith.truncf %49 : vector<1x8x8xf32> to vector<1x8x8xbf16>
    %51 = vector.extract_strided_slice %8 {offsets = [0, 0, 16], sizes = [1, 8, 8], strides = [1, 1, 1]} : vector<1x8x32xf32> to vector<1x8x8xf32>
    %52 = arith.truncf %51 : vector<1x8x8xf32> to vector<1x8x8xbf16>
    %53 = vector.extract_strided_slice %10 {offsets = [0, 0, 16], sizes = [1, 8, 8], strides = [1, 1, 1]} : vector<1x8x32xf32> to vector<1x8x8xf32>
    %54 = arith.truncf %53 : vector<1x8x8xf32> to vector<1x8x8xbf16>
    "tpu.trace_start"() <{level = 10 : i32, message = "bqd,bkd->bqk"}> : () -> ()
    %cst_12 = arith.constant dense<0.000000e+00> : vector<1x8x8xf32>
    %55 = tpu.matmul %50, %52, %cst_12 {dimension_numbers = #tpu.dot_dimension_numbers<[2], [2], [1], [1], [0, 0, 0, 1, 1, 1], [0], [0]>} : vector<1x8x8xbf16>, vector<1x8x8xbf16>, vector<1x8x8xf32> -> vector<1x8x8xf32>
    "tpu.trace_stop"() : () -> ()
    %cst_13 = arith.constant dense<0xFF800000> : vector<1x8xf32>
    %56 = vector.multi_reduction <maximumf>, %55, %cst_13 [2] : vector<1x8x8xf32> to vector<1x8xf32>
    %57 = vector.shape_cast %56 : vector<1x8xf32> to vector<1x8x1xf32>
    %58 = vector.broadcast %57 : vector<1x8x1xf32> to vector<1x8x8xf32>
    %59 = arith.subf %55, %58 : vector<1x8x8xf32>
    %60 = math.exp %59 : vector<1x8x8xf32>
    %cst_14 = arith.constant dense<0.000000e+00> : vector<1x8xf32>
    %61 = vector.multi_reduction <add>, %60, %cst_14 [2] : vector<1x8x8xf32> to vector<1x8xf32>
    %62 = vector.shape_cast %61 : vector<1x8xf32> to vector<1x8x1xf32>
    %63 = arith.truncf %60 : vector<1x8x8xf32> to vector<1x8x8xbf16>
    "tpu.trace_start"() <{level = 10 : i32, message = "bqk,bkd->bqd"}> : () -> ()
    %cst_15 = arith.constant dense<0.000000e+00> : vector<1x8x8xf32>
    %64 = tpu.matmul %63, %54, %cst_15 {dimension_numbers = #tpu.dot_dimension_numbers<[2], [1], [1], [2], [0, 0, 0, 1, 1, 2], [0], [0]>} : vector<1x8x8xbf16>, vector<1x8x8xbf16>, vector<1x8x8xf32> -> vector<1x8x8xf32>
    "tpu.trace_stop"() : () -> ()
    %65 = tpu.reciprocal %62 {approx = true} : vector<1x8x1xf32> -> vector<1x8x1xf32>
    %66 = vector.broadcast %65 : vector<1x8x1xf32> to vector<1x8x8xf32>
    %67 = arith.mulf %64, %66 : vector<1x8x8xf32>
    %68 = vector.extract_strided_slice %6 {offsets = [0, 0, 24], sizes = [1, 8, 8], strides = [1, 1, 1]} : vector<1x8x32xf32> to vector<1x8x8xf32>
    %69 = arith.truncf %68 : vector<1x8x8xf32> to vector<1x8x8xbf16>
    %70 = vector.extract_strided_slice %8 {offsets = [0, 0, 24], sizes = [1, 8, 8], strides = [1, 1, 1]} : vector<1x8x32xf32> to vector<1x8x8xf32>
    %71 = arith.truncf %70 : vector<1x8x8xf32> to vector<1x8x8xbf16>
    %72 = vector.extract_strided_slice %10 {offsets = [0, 0, 24], sizes = [1, 8, 8], strides = [1, 1, 1]} : vector<1x8x32xf32> to vector<1x8x8xf32>
    %73 = arith.truncf %72 : vector<1x8x8xf32> to vector<1x8x8xbf16>
    "tpu.trace_start"() <{level = 10 : i32, message = "bqd,bkd->bqk"}> : () -> ()
    %cst_16 = arith.constant dense<0.000000e+00> : vector<1x8x8xf32>
    %74 = tpu.matmul %69, %71, %cst_16 {dimension_numbers = #tpu.dot_dimension_numbers<[2], [2], [1], [1], [0, 0, 0, 1, 1, 1], [0], [0]>} : vector<1x8x8xbf16>, vector<1x8x8xbf16>, vector<1x8x8xf32> -> vector<1x8x8xf32>
    "tpu.trace_stop"() : () -> ()
    %cst_17 = arith.constant dense<0xFF800000> : vector<1x8xf32>
    %75 = vector.multi_reduction <maximumf>, %74, %cst_17 [2] : vector<1x8x8xf32> to vector<1x8xf32>
    %76 = vector.shape_cast %75 : vector<1x8xf32> to vector<1x8x1xf32>
    %77 = vector.broadcast %76 : vector<1x8x1xf32> to vector<1x8x8xf32>
    %78 = arith.subf %74, %77 : vector<1x8x8xf32>
    %79 = math.exp %78 : vector<1x8x8xf32>
    %cst_18 = arith.constant dense<0.000000e+00> : vector<1x8xf32>
    %80 = vector.multi_reduction <add>, %79, %cst_18 [2] : vector<1x8x8xf32> to vector<1x8xf32>
    %81 = vector.shape_cast %80 : vector<1x8xf32> to vector<1x8x1xf32>
    %82 = arith.truncf %79 : vector<1x8x8xf32> to vector<1x8x8xbf16>
    "tpu.trace_start"() <{level = 10 : i32, message = "bqk,bkd->bqd"}> : () -> ()
    %cst_19 = arith.constant dense<0.000000e+00> : vector<1x8x8xf32>
    %83 = tpu.matmul %82, %73, %cst_19 {dimension_numbers = #tpu.dot_dimension_numbers<[2], [1], [1], [2], [0, 0, 0, 1, 1, 2], [0], [0]>} : vector<1x8x8xbf16>, vector<1x8x8xbf16>, vector<1x8x8xf32> -> vector<1x8x8xf32>
    "tpu.trace_stop"() : () -> ()
    %84 = tpu.reciprocal %81 {approx = true} : vector<1x8x1xf32> -> vector<1x8x1xf32>
    %85 = vector.broadcast %84 : vector<1x8x1xf32> to vector<1x8x8xf32>
    %86 = arith.mulf %83, %85 : vector<1x8x8xf32>
    %87 = tpu.concatenate %29, %48, %67, %86 in 2 : vector<1x8x8xf32>, vector<1x8x8xf32>, vector<1x8x8xf32>, vector<1x8x8xf32> -> vector<1x8x32xf32>
    %88 = vector.shape_cast %87 : vector<1x8x32xf32> to vector<8x32xf32>
    %89 = arith.truncf %88 : vector<8x32xf32> to vector<8x32xbf16>
    %c0_20 = arith.constant 0 : index
    %c0_21 = arith.constant 0 : index
    %90 = vector.load %arg3[%c0_20, %c0_21] : memref<32x32xbf16, #tpu.memory_space<vmem>>, vector<32x32xbf16>
    %cst_22 = arith.constant dense<0.000000e+00> : vector<8x32xf32>
    %91 = tpu.matmul %89, %90, %cst_22 {dimension_numbers = #tpu.dot_dimension_numbers<[1], [0], [0], [1], [0, 0, 1, 1], [], []>} : vector<8x32xbf16>, vector<32x32xbf16>, vector<8x32xf32> -> vector<8x32xf32>
    %92 = arith.addf %1, %91 : vector<8x32xf32>
    %c0_23 = arith.constant 0 : index
    %c0_24 = arith.constant 0 : index
    %93 = vector.load %arg4[%c0_23, %c0_24] : memref<1x32xf32, #tpu.memory_space<vmem>>, vector<1x32xf32>
    %c0_25 = arith.constant 0 : index
    %c0_26 = arith.constant 0 : index
    %94 = vector.load %arg5[%c0_25, %c0_26] : memref<1x32xf32, #tpu.memory_space<vmem>>, vector<1x32xf32>
    %cst_27 = arith.constant dense<0.000000e+00> : vector<8xf32>
    %95 = vector.multi_reduction <add>, %92, %cst_27 [1] : vector<8x32xf32> to vector<8xf32>
    %96 = vector.shape_cast %95 : vector<8xf32> to vector<8x1xf32>
    %cst_28 = arith.constant 3.200000e+01 : f32
    %97 = vector.broadcast %cst_28 : f32 to vector<8x1xf32>
    %98 = arith.divf %96, %97 : vector<8x1xf32>
    %99 = vector.broadcast %98 : vector<8x1xf32> to vector<8x32xf32>
    %100 = arith.subf %92, %99 : vector<8x32xf32>
    %101 = arith.mulf %100, %100 : vector<8x32xf32>
    %cst_29 = arith.constant dense<0.000000e+00> : vector<8xf32>
    %102 = vector.multi_reduction <add>, %101, %cst_29 [1] : vector<8x32xf32> to vector<8xf32>
    %103 = vector.shape_cast %102 : vector<8xf32> to vector<8x1xf32>
    %cst_30 = arith.constant 3.200000e+01 : f32
    %104 = vector.broadcast %cst_30 : f32 to vector<8x1xf32>
    %105 = arith.divf %103, %104 : vector<8x1xf32>
    %106 = vector.broadcast %98 : vector<8x1xf32> to vector<8x32xf32>
    %107 = arith.subf %92, %106 : vector<8x32xf32>
    %cst_31 = arith.constant 9.99999997E-7 : f32
    %108 = vector.broadcast %cst_31 : f32 to vector<8x1xf32>
    %109 = arith.addf %105, %108 : vector<8x1xf32>
    %110 = math.rsqrt %109 : vector<8x1xf32>
    %111 = vector.broadcast %110 : vector<8x1xf32> to vector<8x32xf32>
    %112 = arith.mulf %107, %111 : vector<8x32xf32>
    %113 = vector.broadcast %93 : vector<1x32xf32> to vector<8x32xf32>
    %114 = arith.mulf %112, %113 : vector<8x32xf32>
    %115 = vector.broadcast %94 : vector<1x32xf32> to vector<8x32xf32>
    %116 = arith.addf %114, %115 : vector<8x32xf32>
    %117 = arith.addf %1, %116 : vector<8x32xf32>
    %c0_32 = arith.constant 0 : index
    %c0_33 = arith.constant 0 : index
    %118 = vector.load %arg6[%c0_32, %c0_33] : memref<1x32xf32, #tpu.memory_space<vmem>>, vector<1x32xf32>
    %c0_34 = arith.constant 0 : index
    %c0_35 = arith.constant 0 : index
    %119 = vector.load %arg7[%c0_34, %c0_35] : memref<1x32xf32, #tpu.memory_space<vmem>>, vector<1x32xf32>
    %cst_36 = arith.constant dense<0.000000e+00> : vector<8xf32>
    %120 = vector.multi_reduction <add>, %117, %cst_36 [1] : vector<8x32xf32> to vector<8xf32>
    %121 = vector.shape_cast %120 : vector<8xf32> to vector<8x1xf32>
    %cst_37 = arith.constant 3.200000e+01 : f32
    %122 = vector.broadcast %cst_37 : f32 to vector<8x1xf32>
    %123 = arith.divf %121, %122 : vector<8x1xf32>
    %124 = vector.broadcast %123 : vector<8x1xf32> to vector<8x32xf32>
    %125 = arith.subf %117, %124 : vector<8x32xf32>
    %126 = arith.mulf %125, %125 : vector<8x32xf32>
    %cst_38 = arith.constant dense<0.000000e+00> : vector<8xf32>
    %127 = vector.multi_reduction <add>, %126, %cst_38 [1] : vector<8x32xf32> to vector<8xf32>
    %128 = vector.shape_cast %127 : vector<8xf32> to vector<8x1xf32>
    %cst_39 = arith.constant 3.200000e+01 : f32
    %129 = vector.broadcast %cst_39 : f32 to vector<8x1xf32>
    %130 = arith.divf %128, %129 : vector<8x1xf32>
    %131 = vector.broadcast %123 : vector<8x1xf32> to vector<8x32xf32>
    %132 = arith.subf %117, %131 : vector<8x32xf32>
    %cst_40 = arith.constant 9.99999974E-6 : f32
    %133 = vector.broadcast %cst_40 : f32 to vector<8x1xf32>
    %134 = arith.addf %130, %133 : vector<8x1xf32>
    %135 = math.rsqrt %134 : vector<8x1xf32>
    %136 = vector.broadcast %135 : vector<8x1xf32> to vector<8x32xf32>
    %137 = arith.mulf %132, %136 : vector<8x32xf32>
    %138 = vector.broadcast %118 : vector<1x32xf32> to vector<8x32xf32>
    %139 = arith.mulf %137, %138 : vector<8x32xf32>
    %140 = vector.broadcast %119 : vector<1x32xf32> to vector<8x32xf32>
    %141 = arith.addf %139, %140 : vector<8x32xf32>
    %142 = arith.truncf %141 : vector<8x32xf32> to vector<8x32xbf16>
    %c0_41 = arith.constant 0 : index
    %c0_42 = arith.constant 0 : index
    %143 = vector.load %arg8[%c0_41, %c0_42] : memref<32x64xbf16, #tpu.memory_space<vmem>>, vector<32x64xbf16>
    %cst_43 = arith.constant dense<0.000000e+00> : vector<8x64xf32>
    %144 = tpu.matmul %142, %143, %cst_43 {dimension_numbers = #tpu.dot_dimension_numbers<[1], [0], [0], [1], [0, 0, 1, 1], [], []>} : vector<8x32xbf16>, vector<32x64xbf16>, vector<8x64xf32> -> vector<8x64xf32>
    %c0_44 = arith.constant 0 : index
    %c0_45 = arith.constant 0 : index
    %145 = vector.load %arg9[%c0_44, %c0_45] : memref<1x64xf32, #tpu.memory_space<vmem>>, vector<1x64xf32>
    %146 = vector.broadcast %145 : vector<1x64xf32> to vector<8x64xf32>
    %147 = arith.addf %144, %146 : vector<8x64xf32>
    %cst_46 = arith.constant 0.000000e+00 : f32
    %148 = vector.broadcast %cst_46 : f32 to vector<8x64xf32>
    %149 = arith.maximumf %147, %148 : vector<8x64xf32>
    %150 = arith.truncf %149 : vector<8x64xf32> to vector<8x64xbf16>
    %c0_47 = arith.constant 0 : index
    %c0_48 = arith.constant 0 : index
    %151 = vector.load %arg10[%c0_47, %c0_48] : memref<64x32xbf16, #tpu.memory_space<vmem>>, vector<64x32xbf16>
    %cst_49 = arith.constant dense<0.000000e+00> : vector<8x32xf32>
    %152 = tpu.matmul %150, %151, %cst_49 {dimension_numbers = #tpu.dot_dimension_numbers<[1], [0], [0], [1], [0, 0, 1, 1], [], []>} : vector<8x64xbf16>, vector<64x32xbf16>, vector<8x32xf32> -> vector<8x32xf32>
    %c0_50 = arith.constant 0 : index
    %c0_51 = arith.constant 0 : index
    %153 = vector.load %arg11[%c0_50, %c0_51] : memref<1x32xf32, #tpu.memory_space<vmem>>, vector<1x32xf32>
    %154 = vector.broadcast %153 : vector<1x32xf32> to vector<8x32xf32>
    %155 = arith.addf %152, %154 : vector<8x32xf32>
    %156 = arith.addf %141, %155 : vector<8x32xf32>
    %c0_52 = arith.constant 0 : index
    %c0_53 = arith.constant 0 : index
    %157 = vector.load %arg12[%c0_52, %c0_53] : memref<1x32xf32, #tpu.memory_space<vmem>>, vector<1x32xf32>
    %c0_54 = arith.constant 0 : index
    %c0_55 = arith.constant 0 : index
    %158 = vector.load %arg13[%c0_54, %c0_55] : memref<1x32xf32, #tpu.memory_space<vmem>>, vector<1x32xf32>
    %cst_56 = arith.constant dense<0.000000e+00> : vector<8xf32>
    %159 = vector.multi_reduction <add>, %156, %cst_56 [1] : vector<8x32xf32> to vector<8xf32>
    %160 = vector.shape_cast %159 : vector<8xf32> to vector<8x1xf32>
    %cst_57 = arith.constant 3.200000e+01 : f32
    %161 = vector.broadcast %cst_57 : f32 to vector<8x1xf32>
    %162 = arith.divf %160, %161 : vector<8x1xf32>
    %163 = vector.broadcast %162 : vector<8x1xf32> to vector<8x32xf32>
    %164 = arith.subf %156, %163 : vector<8x32xf32>
    %165 = arith.mulf %164, %164 : vector<8x32xf32>
    %cst_58 = arith.constant dense<0.000000e+00> : vector<8xf32>
    %166 = vector.multi_reduction <add>, %165, %cst_58 [1] : vector<8x32xf32> to vector<8xf32>
    %167 = vector.shape_cast %166 : vector<8xf32> to vector<8x1xf32>
    %cst_59 = arith.constant 3.200000e+01 : f32
    %168 = vector.broadcast %cst_59 : f32 to vector<8x1xf32>
    %169 = arith.divf %167, %168 : vector<8x1xf32>
    %170 = vector.broadcast %162 : vector<8x1xf32> to vector<8x32xf32>
    %171 = arith.subf %156, %170 : vector<8x32xf32>
    %cst_60 = arith.constant 9.99999974E-6 : f32
    %172 = vector.broadcast %cst_60 : f32 to vector<8x1xf32>
    %173 = arith.addf %169, %172 : vector<8x1xf32>
    %174 = math.rsqrt %173 : vector<8x1xf32>
    %175 = vector.broadcast %174 : vector<8x1xf32> to vector<8x32xf32>
    %176 = arith.mulf %171, %175 : vector<8x32xf32>
    %177 = vector.broadcast %157 : vector<1x32xf32> to vector<8x32xf32>
    %178 = arith.mulf %176, %177 : vector<8x32xf32>
    %179 = vector.broadcast %158 : vector<1x32xf32> to vector<8x32xf32>
    %180 = arith.addf %178, %179 : vector<8x32xf32>
    %181 = vector.shape_cast %180 : vector<8x32xf32> to vector<1x8x32xf32>
    %c0_61 = arith.constant 0 : index
    %c0_62 = arith.constant 0 : index
    %c0_63 = arith.constant 0 : index
    %182 = vector.load %arg14[%c0_61, %c0_62, %c0_63] : memref<1x8x32xf32, #tpu.memory_space<vmem>>, vector<1x8x32xf32>
    tpu.vector_store %arg14[%c0_61, %c0_62, %c0_63], %181 {strides = array<i32>} : memref<1x8x32xf32, #tpu.memory_space<vmem>>, vector<1x8x32xf32>,
    return
  }
  func.func @transform_0(%arg0: i32) -> (i32, i32, i32) {
    %c0_i32 = arith.constant 0 : i32
    %c0_i32_0 = arith.constant 0 : i32
    %c0_i32_1 = arith.constant 0 : i32
    return %arg0, %c0_i32, %c0_i32_0 : i32, i32, i32
  }
  func.func @transform_1(%arg0: i32) -> (i32, i32) {
    %c0_i32 = arith.constant 0 : i32
    %c0_i32_0 = arith.constant 0 : i32
    %c0_i32_1 = arith.constant 0 : i32
    return %c0_i32, %c0_i32_0 : i32, i32
  }
  func.func @transform_2(%arg0: i32) -> (i32, i32) {
    %c0_i32 = arith.constant 0 : i32
    %c0_i32_0 = arith.constant 0 : i32
    %c0_i32_1 = arith.constant 0 : i32
    return %c0_i32, %c0_i32_0 : i32, i32
  }
  func.func @transform_3(%arg0: i32) -> (i32, i32) {
    %c0_i32 = arith.constant 0 : i32
    %c0_i32_0 = arith.constant 0 : i32
    %c0_i32_1 = arith.constant 0 : i32
    return %c0_i32, %c0_i32_0 : i32, i32
  }
  func.func @transform_4(%arg0: i32) -> (i32, i32) {
    %c0_i32 = arith.constant 0 : i32
    %c0_i32_0 = arith.constant 0 : i32
    %c0_i32_1 = arith.constant 0 : i32
    return %c0_i32, %c0_i32_0 : i32, i32
  }
  func.func @transform_5(%arg0: i32) -> (i32, i32) {
    %c0_i32 = arith.constant 0 : i32
    %c0_i32_0 = arith.constant 0 : i32
    %c0_i32_1 = arith.constant 0 : i32
    return %c0_i32, %c0_i32_0 : i32, i32
  }
  func.func @transform_6(%arg0: i32) -> (i32, i32) {
    %c0_i32 = arith.constant 0 : i32
    %c0_i32_0 = arith.constant 0 : i32
    %c0_i32_1 = arith.constant 0 : i32
    return %c0_i32, %c0_i32_0 : i32, i32
  }
  func.func @transform_7(%arg0: i32) -> (i32, i32) {
    %c0_i32 = arith.constant 0 : i32
    %c0_i32_0 = arith.constant 0 : i32
    %c0_i32_1 = arith.constant 0 : i32
    return %c0_i32, %c0_i32_0 : i32, i32
  }
  func.func @transform_8(%arg0: i32) -> (i32, i32) {
    %c0_i32 = arith.constant 0 : i32
    %c0_i32_0 = arith.constant 0 : i32
    %c0_i32_1 = arith.constant 0 : i32
    return %c0_i32, %c0_i32_0 : i32, i32
  }
  func.func @transform_9(%arg0: i32) -> (i32, i32) {
    %c0_i32 = arith.constant 0 : i32
    %c0_i32_0 = arith.constant 0 : i32
    %c0_i32_1 = arith.constant 0 : i32
    return %c0_i32, %c0_i32_0 : i32, i32
  }
  func.func @transform_10(%arg0: i32) -> (i32, i32) {
    %c0_i32 = arith.constant 0 : i32
    %c0_i32_0 = arith.constant 0 : i32
    %c0_i32_1 = arith.constant 0 : i32
    return %c0_i32, %c0_i32_0 : i32, i32
  }
  func.func @transform_11(%arg0: i32) -> (i32, i32) {
    %c0_i32 = arith.constant 0 : i32
    %c0_i32_0 = arith.constant 0 : i32
    %c0_i32_1 = arith.constant 0 : i32
    return %c0_i32, %c0_i32_0 : i32, i32
  }
  func.func @transform_12(%arg0: i32) -> (i32, i32) {
    %c0_i32 = arith.constant 0 : i32
    %c0_i32_0 = arith.constant 0 : i32
    %c0_i32_1 = arith.constant 0 : i32
    return %c0_i32, %c0_i32_0 : i32, i32
  }
  func.func @transform_13(%arg0: i32) -> (i32, i32, i32) {
    %c0_i32 = arith.constant 0 : i32
    %c0_i32_0 = arith.constant 0 : i32
    %c0_i32_1 = arith.constant 0 : i32
    return %arg0, %c0_i32, %c0_i32_0 : i32, i32, i32
  }
}

module attributes {stable_mosaic.version = 11 : i64} {
  func.func @encoder_layer_kernel(%arg0: i32, %arg1: memref<1x8x32xf32, #tpu.memory_space<vmem>>, %arg2: memref<32x96xbf16, #tpu.memory_space<vmem>>, %arg3: memref<32x32xbf16, #tpu.memory_space<vmem>>, %arg4: memref<1x32xf32, #tpu.memory_space<vmem>>, %arg5: memref<1x32xf32, #tpu.memory_space<vmem>>, %arg6: memref<1x32xf32, #tpu.memory_space<vmem>>, %arg7: memref<1x32xf32, #tpu.memory_space<vmem>>, %arg8: memref<32x64xbf16, #tpu.memory_space<vmem>>, %arg9: memref<1x64xf32, #tpu.memory_space<vmem>>, %arg10: memref<64x32xbf16, #tpu.memory_space<vmem>>, %arg11: memref<1x32xf32, #tpu.memory_space<vmem>>, %arg12: memref<1x32xf32, #tpu.memory_space<vmem>>, %arg13: memref<1x32xf32, #tpu.memory_space<vmem>>, %arg14: memref<1x8x32xf32, #tpu.memory_space<vmem>>) attributes {dimension_semantics = [#tpu.dimension_semantics<parallel>], iteration_bounds = array<i64: 2>, scalar_prefetch = 0 : i64, scratch_operands = 0 : i64, tpu.core_type = #tpu.core_type<tc>, window_params = [{transform_indices = @transform_0, window_bounds = array<i64: 1, 8, 32>}, {pipeline_mode = #tpu.pipeline_mode<synchronous>, transform_indices = @transform_1, window_bounds = array<i64: 32, 96>}, {pipeline_mode = #tpu.pipeline_mode<synchronous>, transform_indices = @transform_2, window_bounds = array<i64: 32, 32>}, {pipeline_mode = #tpu.pipeline_mode<synchronous>, transform_indices = @transform_3, window_bounds = array<i64: 1, 32>}, {pipeline_mode = #tpu.pipeline_mode<synchronous>, transform_indices = @transform_4, window_bounds = array<i64: 1, 32>}, {pipeline_mode = #tpu.pipeline_mode<synchronous>, transform_indices = @transform_5, window_bounds = array<i64: 1, 32>}, {pipeline_mode = #tpu.pipeline_mode<synchronous>, transform_indices = @transform_6, window_bounds = array<i64: 1, 32>}, {pipeline_mode = #tpu.pipeline_mode<synchronous>, transform_indices = @transform_7, window_bounds = array<i64: 32, 64>}, {pipeline_mode = #tpu.pipeline_mode<synchronous>, transform_indices = @transform_8, window_bounds = array<i64: 1, 64>}, {pipeline_mode = #tpu.pipeline_mode<synchronous>, transform_indices = @transform_9, window_bounds = array<i64: 64, 32>}, {pipeline_mode = #tpu.pipeline_mode<synchronous>, transform_indices = @transform_10, window_bounds = array<i64: 1, 32>}, {pipeline_mode = #tpu.pipeline_mode<synchronous>, transform_indices = @transform_11, window_bounds = array<i64: 1, 32>}, {pipeline_mode = #tpu.pipeline_mode<synchronous>, transform_indices = @transform_12, window_bounds = array<i64: 1, 32>}, {transform_indices = @transform_13, window_bounds = array<i64: 1, 8, 32>}]} {
    %c0 = arith.constant 0 : index
    %c0_0 = arith.constant 0 : index
    %c0_1 = arith.constant 0 : index
    %0 = vector.load %arg1[%c0, %c0_0, %c0_1] : memref<1x8x32xf32, #tpu.memory_space<vmem>>, vector<1x8x32xf32>
    %1 = vector.shape_cast %0 : vector<1x8x32xf32> to vector<8x32xf32>
    %2 = arith.truncf %1 : vector<8x32xf32> to vector<8x32xbf16>
    %c0_2 = arith.constant 0 : index
    %c0_3 = arith.constant 0 : index
    %3 = vector.load %arg2[%c0_2, %c0_3] : memref<32x96xbf16, #tpu.memory_space<vmem>>, vector<32x96xbf16>
    %cst = arith.constant dense<0.000000e+00> : vector<8x96xf32>
    %4 = tpu.matmul %2, %3, %cst {dimension_numbers = #tpu.dot_dimension_numbers<[1], [0], [0], [1], [0, 0, 1, 1], [], []>} : vector<8x32xbf16>, vector<32x96xbf16>, vector<8x96xf32> -> vector<8x96xf32>
    %5 = vector.extract_strided_slice %4 {offsets = [0, 0], sizes = [8, 32], strides = [1, 1]} : vector<8x96xf32> to vector<8x32xf32>
    %6 = vector.shape_cast %5 : vector<8x32xf32> to vector<1x8x32xf32>
    %7 = vector.extract_strided_slice %4 {offsets = [0, 32], sizes = [8, 32], strides = [1, 1]} : vector<8x96xf32> to vector<8x32xf32>
    %8 = vector.shape_cast %7 : vector<8x32xf32> to vector<1x8x32xf32>
    %9 = vector.extract_strided_slice %4 {offsets = [0, 64], sizes = [8, 32], strides = [1, 1]} : vector<8x96xf32> to vector<8x32xf32>
    %10 = vector.shape_cast %9 : vector<8x32xf32> to vector<1x8x32xf32>
    %11 = vector.extract_strided_slice %6 {offsets = [0, 0, 0], sizes = [1, 8, 8], strides = [1, 1, 1]} : vector<1x8x32xf32> to vector<1x8x8xf32>
    %12 = arith.truncf %11 : vector<1x8x8xf32> to vector<1x8x8xbf16>
    %13 = vector.extract_strided_slice %8 {offsets = [0, 0, 0], sizes = [1, 8, 8], strides = [1, 1, 1]} : vector<1x8x32xf32> to vector<1x8x8xf32>
    %14 = arith.truncf %13 : vector<1x8x8xf32> to vector<1x8x8xbf16>
    %15 = vector.extract_strided_slice %10 {offsets = [0, 0, 0], sizes = [1, 8, 8], strides = [1, 1, 1]} : vector<1x8x32xf32> to vector<1x8x8xf32>
    %16 = arith.truncf %15 : vector<1x8x8xf32> to vector<1x8x8xbf16>
    "tpu.trace_start"() <{level = 10 : i32, message = "bqd,bkd->bqk"}> : () -> ()
    %cst_4 = arith.constant dense<0.000000e+00> : vector<1x8x8xf32>
    %17 = tpu.matmul %12, %14, %cst_4 {dimension_numbers = #tpu.dot_dimension_numbers<[2], [2], [1], [1], [0, 0, 0, 1, 1, 1], [0], [0]>} : vector<1x8x8xbf16>, vector<1x8x8xbf16>, vector<1x8x8xf32> -> vector<1x8x8xf32>
    "tpu.trace_stop"() : () -> ()
    %cst_5 = arith.constant dense<0xFF800000> : vector<1x8xf32>
    %18 = vector.multi_reduction <maximumf>, %17, %cst_5 [2] : vector<1x8x8xf32> to vector<1x8xf32>
    %19 = vector.shape_cast %18 : vector<1x8xf32> to vector<1x8x1xf32>
    %20 = vector.broadcast %19 : vector<1x8x1xf32> to vector<1x8x8xf32>
    %21 = arith.subf %17, %20 : vector<1x8x8xf32>
    %22 = math.exp %21 : vector<1x8x8xf32>
    %cst_6 = arith.constant dense<0.000000e+00> : vector<1x8xf32>
    %23 = vector.multi_reduction <add>, %22, %cst_6 [2] : vector<1x8x8xf32> to vector<1x8xf32>
    %24 = vector.shape_cast %23 : vector<1x8xf32> to vector<1x8x1xf32>
    %25 = arith.truncf %22 : vector<1x8x8xf32> to vector<1x8x8xbf16>
    "tpu.trace_start"() <{level = 10 : i32, message = "bqk,bkd->bqd"}> : () -> ()
    %cst_7 = arith.constant dense<0.000000e+00> : vector<1x8x8xf32>
    %26 = tpu.matmul %25, %16, %cst_7 {dimension_numbers = #tpu.dot_dimension_numbers<[2], [1], [1], [2], [0, 0, 0, 1, 1, 2], [0], [0]>} : vector<1x8x8xbf16>, vector<1x8x8xbf16>, vector<1x8x8xf32> -> vector<1x8x8xf32>
    "tpu.trace_stop"() : () -> ()
    %27 = tpu.reciprocal %24 {approx = true} : vector<1x8x1xf32> -> vector<1x8x1xf32>
    %28 = vector.broadcast %27 : vector<1x8x1xf32> to vector<1x8x8xf32>
    %29 = arith.mulf %26, %28 : vector<1x8x8xf32>
    %30 = vector.extract_strided_slice %6 {offsets = [0, 0, 8], sizes = [1, 8, 8], strides = [1, 1, 1]} : vector<1x8x32xf32> to vector<1x8x8xf32>
    %31 = arith.truncf %30 : vector<1x8x8xf32> to vector<1x8x8xbf16>
    %32 = vector.extract_strided_slice %8 {offsets = [0, 0, 8], sizes = [1, 8, 8], strides = [1, 1, 1]} : vector<1x8x32xf32> to vector<1x8x8xf32>
    %33 = arith.truncf %32 : vector<1x8x8xf32> to vector<1x8x8xbf16>
    %34 = vector.extract_strided_slice %10 {offsets = [0, 0, 8], sizes = [1, 8, 8], strides = [1, 1, 1]} : vector<1x8x32xf32> to vector<1x8x8xf32>
    %35 = arith.truncf %34 : vector<1x8x8xf32> to vector<1x8x8xbf16>
    "tpu.trace_start"() <{level = 10 : i32, message = "bqd,bkd->bqk"}> : () -> ()
    %cst_8 = arith.constant dense<0.000000e+00> : vector<1x8x8xf32>
    %36 = tpu.matmul %31, %33, %cst_8 {dimension_numbers = #tpu.dot_dimension_numbers<[2], [2], [1], [1], [0, 0, 0, 1, 1, 1], [0], [0]>} : vector<1x8x8xbf16>, vector<1x8x8xbf16>, vector<1x8x8xf32> -> vector<1x8x8xf32>
    "tpu.trace_stop"() : () -> ()
    %cst_9 = arith.constant dense<0xFF800000> : vector<1x8xf32>
    %37 = vector.multi_reduction <maximumf>, %36, %cst_9 [2] : vector<1x8x8xf32> to vector<1x8xf32>
    %38 = vector.shape_cast %37 : vector<1x8xf32> to vector<1x8x1xf32>
    %39 = vector.broadcast %38 : vector<1x8x1xf32> to vector<1x8x8xf32>
    %40 = arith.subf %36, %39 : vector<1x8x8xf32>
    %41 = math.exp %40 : vector<1x8x8xf32>
    %cst_10 = arith.constant dense<0.000000e+00> : vector<1x8xf32>
    %42 = vector.multi_reduction <add>, %41, %cst_10 [2] : vector<1x8x8xf32> to vector<1x8xf32>
    %43 = vector.shape_cast %42 : vector<1x8xf32> to vector<1x8x1xf32>
    %44 = arith.truncf %41 : vector<1x8x8xf32> to vector<1x8x8xbf16>
    "tpu.trace_start"() <{level = 10 : i32, message = "bqk,bkd->bqd"}> : () -> ()
    %cst_11 = arith.constant dense<0.000000e+00> : vector<1x8x8xf32>
    %45 = tpu.matmul %44, %35, %cst_11 {dimension_numbers = #tpu.dot_dimension_numbers<[2], [1], [1], [2], [0, 0, 0, 1, 1, 2], [0], [0]>} : vector<1x8x8xbf16>, vector<1x8x8xbf16>, vector<1x8x8xf32> -> vector<1x8x8xf32>
    "tpu.trace_stop"() : () -> ()
    %46 = tpu.reciprocal %43 {approx = true} : vector<1x8x1xf32> -> vector<1x8x1xf32>
    %47 = vector.broadcast %46 : vector<1x8x1xf32> to vector<1x8x8xf32>
    %48 = arith.mulf %45, %47 : vector<1x8x8xf32>
    %49 = vector.extract_strided_slice %6 {offsets = [0, 0, 16], sizes = [1, 8, 8], strides = [1, 1, 1]} : vector<1x8x32xf32> to vector<1x8x8xf32>
    %50 = arith.truncf %49 : vector<1x8x8xf32> to vector<1x8x8xbf16>
    %51 = vector.extract_strided_slice %8 {offsets = [0, 0, 16], sizes = [1, 8, 8], strides = [1, 1, 1]} : vector<1x8x32xf32> to vector<1x8x8xf32>
    %52 = arith.truncf %51 : vector<1x8x8xf32> to vector<1x8x8xbf16>
    %53 = vector.extract_strided_slice %10 {offsets = [0, 0, 16], sizes = [1, 8, 8], strides = [1, 1, 1]} : vector<1x8x32xf32> to vector<1x8x8xf32>
    %54 = arith.truncf %53 : vector<1x8x8xf32> to vector<1x8x8xbf16>
    "tpu.trace_start"() <{level = 10 : i32, message = "bqd,bkd->bqk"}> : () -> ()
    %cst_12 = arith.constant dense<0.000000e+00> : vector<1x8x8xf32>
    %55 = tpu.matmul %50, %52, %cst_12 {dimension_numbers = #tpu.dot_dimension_numbers<[2], [2], [1], [1], [0, 0, 0, 1, 1, 1], [0], [0]>} : vector<1x8x8xbf16>, vector<1x8x8xbf16>, vector<1x8x8xf32> -> vector<1x8x8xf32>
    "tpu.trace_stop"() : () -> ()
    %cst_13 = arith.constant dense<0xFF800000> : vector<1x8xf32>
    %56 = vector.multi_reduction <maximumf>, %55, %cst_13 [2] : vector<1x8x8xf32> to vector<1x8xf32>
    %57 = vector.shape_cast %56 : vector<1x8xf32> to vector<1x8x1xf32>
    %58 = vector.broadcast %57 : vector<1x8x1xf32> to vector<1x8x8xf32>
    %59 = arith.subf %55, %58 : vector<1x8x8xf32>
    %60 = math.exp %59 : vector<1x8x8xf32>
    %cst_14 = arith.constant dense<0.000000e+00> : vector<1x8xf32>
    %61 = vector.multi_reduction <add>, %60, %cst_14 [2] : vector<1x8x8xf32> to vector<1x8xf32>
    %62 = vector.shape_cast %61 : vector<1x8xf32> to vector<1x8x1xf32>
    %63 = arith.truncf %60 : vector<1x8x8xf32> to vector<1x8x8xbf16>
    "tpu.trace_start"() <{level = 10 : i32, message = "bqk,bkd->bqd"}> : () -> ()
    %cst_15 = arith.constant dense<0.000000e+00> : vector<1x8x8xf32>
    %64 = tpu.matmul %63, %54, %cst_15 {dimension_numbers = #tpu.dot_dimension_numbers<[2], [1], [1], [2], [0, 0, 0, 1, 1, 2], [0], [0]>} : vector<1x8x8xbf16>, vector<1x8x8xbf16>, vector<1x8x8xf32> -> vector<1x8x8xf32>
    "tpu.trace_stop"() : () -> ()
    %65 = tpu.reciprocal %62 {approx = true} : vector<1x8x1xf32> -> vector<1x8x1xf32>
    %66 = vector.broadcast %65 : vector<1x8x1xf32> to vector<1x8x8xf32>
    %67 = arith.mulf %64, %66 : vector<1x8x8xf32>
    %68 = vector.extract_strided_slice %6 {offsets = [0, 0, 24], sizes = [1, 8, 8], strides = [1, 1, 1]} : vector<1x8x32xf32> to vector<1x8x8xf32>
    %69 = arith.truncf %68 : vector<1x8x8xf32> to vector<1x8x8xbf16>
    %70 = vector.extract_strided_slice %8 {offsets = [0, 0, 24], sizes = [1, 8, 8], strides = [1, 1, 1]} : vector<1x8x32xf32> to vector<1x8x8xf32>
    %71 = arith.truncf %70 : vector<1x8x8xf32> to vector<1x8x8xbf16>
    %72 = vector.extract_strided_slice %10 {offsets = [0, 0, 24], sizes = [1, 8, 8], strides = [1, 1, 1]} : vector<1x8x32xf32> to vector<1x8x8xf32>
    %73 = arith.truncf %72 : vector<1x8x8xf32> to vector<1x8x8xbf16>
    "tpu.trace_start"() <{level = 10 : i32, message = "bqd,bkd->bqk"}> : () -> ()
    %cst_16 = arith.constant dense<0.000000e+00> : vector<1x8x8xf32>
    %74 = tpu.matmul %69, %71, %cst_16 {dimension_numbers = #tpu.dot_dimension_numbers<[2], [2], [1], [1], [0, 0, 0, 1, 1, 1], [0], [0]>} : vector<1x8x8xbf16>, vector<1x8x8xbf16>, vector<1x8x8xf32> -> vector<1x8x8xf32>
    "tpu.trace_stop"() : () -> ()
    %cst_17 = arith.constant dense<0xFF800000> : vector<1x8xf32>
    %75 = vector.multi_reduction <maximumf>, %74, %cst_17 [2] : vector<1x8x8xf32> to vector<1x8xf32>
    %76 = vector.shape_cast %75 : vector<1x8xf32> to vector<1x8x1xf32>
    %77 = vector.broadcast %76 : vector<1x8x1xf32> to vector<1x8x8xf32>
    %78 = arith.subf %74, %77 : vector<1x8x8xf32>
    %79 = math.exp %78 : vector<1x8x8xf32>
    %cst_18 = arith.constant dense<0.000000e+00> : vector<1x8xf32>
    %80 = vector.multi_reduction <add>, %79, %cst_18 [2] : vector<1x8x8xf32> to vector<1x8xf32>
    %81 = vector.shape_cast %80 : vector<1x8xf32> to vector<1x8x1xf32>
    %82 = arith.truncf %79 : vector<1x8x8xf32> to vector<1x8x8xbf16>
    "tpu.trace_start"() <{level = 10 : i32, message = "bqk,bkd->bqd"}> : () -> ()
    %cst_19 = arith.constant dense<0.000000e+00> : vector<1x8x8xf32>
    %83 = tpu.matmul %82, %73, %cst_19 {dimension_numbers = #tpu.dot_dimension_numbers<[2], [1], [1], [2], [0, 0, 0, 1, 1, 2], [0], [0]>} : vector<1x8x8xbf16>, vector<1x8x8xbf16>, vector<1x8x8xf32> -> vector<1x8x8xf32>
    "tpu.trace_stop"() : () -> ()
    %84 = tpu.reciprocal %81 {approx = true} : vector<1x8x1xf32> -> vector<1x8x1xf32>
    %85 = vector.broadcast %84 : vector<1x8x1xf32> to vector<1x8x8xf32>
    %86 = arith.mulf %83, %85 : vector<1x8x8xf32>
    %87 = tpu.concatenate %29, %48, %67, %86 in 2 : vector<1x8x8xf32>, vector<1x8x8xf32>, vector<1x8x8xf32>, vector<1x8x8xf32> -> vector<1x8x32xf32>
    %88 = vector.shape_cast %87 : vector<1x8x32xf32> to vector<8x32xf32>
    %89 = arith.truncf %88 : vector<8x32xf32> to vector<8x32xbf16>
    %c0_20 = arith.constant 0 : index
    %c0_21 = arith.constant 0 : index
    %90 = vector.load %arg3[%c0_20, %c0_21] : memref<32x32xbf16, #tpu.memory_space<vmem>>, vector<32x32xbf16>
    %cst_22 = arith.constant dense<0.000000e+00> : vector<8x32xf32>
    %91 = tpu.matmul %89, %90, %cst_22 {dimension_numbers = #tpu.dot_dimension_numbers<[1], [0], [0], [1], [0, 0, 1, 1], [], []>} : vector<8x32xbf16>, vector<32x32xbf16>, vector<8x32xf32> -> vector<8x32xf32>
    %92 = arith.addf %1, %91 : vector<8x32xf32>
    %c0_23 = arith.constant 0 : index
    %c0_24 = arith.constant 0 : index
    %93 = vector.load %arg4[%c0_23, %c0_24] : memref<1x32xf32, #tpu.memory_space<vmem>>, vector<1x32xf32>
    %c0_25 = arith.constant 0 : index
    %c0_26 = arith.constant 0 : index
    %94 = vector.load %arg5[%c0_25, %c0_26] : memref<1x32xf32, #tpu.memory_space<vmem>>, vector<1x32xf32>
    %cst_27 = arith.constant dense<0.000000e+00> : vector<8xf32>
    %95 = vector.multi_reduction <add>, %92, %cst_27 [1] : vector<8x32xf32> to vector<8xf32>
    %96 = vector.shape_cast %95 : vector<8xf32> to vector<8x1xf32>
    %cst_28 = arith.constant 3.200000e+01 : f32
    %97 = vector.broadcast %cst_28 : f32 to vector<8x1xf32>
    %98 = arith.divf %96, %97 : vector<8x1xf32>
    %99 = vector.broadcast %98 : vector<8x1xf32> to vector<8x32xf32>
    %100 = arith.subf %92, %99 : vector<8x32xf32>
    %101 = arith.mulf %100, %100 : vector<8x32xf32>
    %cst_29 = arith.constant dense<0.000000e+00> : vector<8xf32>
    %102 = vector.multi_reduction <add>, %101, %cst_29 [1] : vector<8x32xf32> to vector<8xf32>
    %103 = vector.shape_cast %102 : vector<8xf32> to vector<8x1xf32>
    %cst_30 = arith.constant 3.200000e+01 : f32
    %104 = vector.broadcast %cst_30 : f32 to vector<8x1xf32>
    %105 = arith.divf %103, %104 : vector<8x1xf32>
    %106 = vector.broadcast %98 : vector<8x1xf32> to vector<8x32xf32>
    %107 = arith.subf %92, %106 : vector<8x32xf32>
    %cst_31 = arith.constant 9.99999997E-7 : f32
    %108 = vector.broadcast %cst_31 : f32 to vector<8x1xf32>
    %109 = arith.addf %105, %108 : vector<8x1xf32>
    %110 = math.rsqrt %109 : vector<8x1xf32>
    %111 = vector.broadcast %110 : vector<8x1xf32> to vector<8x32xf32>
    %112 = arith.mulf %107, %111 : vector<8x32xf32>
    %113 = vector.broadcast %93 : vector<1x32xf32> to vector<8x32xf32>
    %114 = arith.mulf %112, %113 : vector<8x32xf32>
    %115 = vector.broadcast %94 : vector<1x32xf32> to vector<8x32xf32>
    %116 = arith.addf %114, %115 : vector<8x32xf32>
    %117 = arith.addf %1, %116 : vector<8x32xf32>
    %c0_32 = arith.constant 0 : index
    %c0_33 = arith.constant 0 : index
    %118 = vector.load %arg6[%c0_32, %c0_33] : memref<1x32xf32, #tpu.memory_space<vmem>>, vector<1x32xf32>
    %c0_34 = arith.constant 0 : index
    %c0_35 = arith.constant 0 : index
    %119 = vector.load %arg7[%c0_34, %c0_35] : memref<1x32xf32, #tpu.memory_space<vmem>>, vector<1x32xf32>
    %cst_36 = arith.constant dense<0.000000e+00> : vector<8xf32>
    %120 = vector.multi_reduction <add>, %117, %cst_36 [1] : vector<8x32xf32> to vector<8xf32>
    %121 = vector.shape_cast %120 : vector<8xf32> to vector<8x1xf32>
    %cst_37 = arith.constant 3.200000e+01 : f32
    %122 = vector.broadcast %cst_37 : f32 to vector<8x1xf32>
    %123 = arith.divf %121, %122 : vector<8x1xf32>
    %124 = vector.broadcast %123 : vector<8x1xf32> to vector<8x32xf32>
    %125 = arith.subf %117, %124 : vector<8x32xf32>
    %126 = arith.mulf %125, %125 : vector<8x32xf32>
    %cst_38 = arith.constant dense<0.000000e+00> : vector<8xf32>
    %127 = vector.multi_reduction <add>, %126, %cst_38 [1] : vector<8x32xf32> to vector<8xf32>
    %128 = vector.shape_cast %127 : vector<8xf32> to vector<8x1xf32>
    %cst_39 = arith.constant 3.200000e+01 : f32
    %129 = vector.broadcast %cst_39 : f32 to vector<8x1xf32>
    %130 = arith.divf %128, %129 : vector<8x1xf32>
    %131 = vector.broadcast %123 : vector<8x1xf32> to vector<8x32xf32>
    %132 = arith.subf %117, %131 : vector<8x32xf32>
    %cst_40 = arith.constant 9.99999974E-6 : f32
    %133 = vector.broadcast %cst_40 : f32 to vector<8x1xf32>
    %134 = arith.addf %130, %133 : vector<8x1xf32>
    %135 = math.rsqrt %134 : vector<8x1xf32>
    %136 = vector.broadcast %135 : vector<8x1xf32> to vector<8x32xf32>
    %137 = arith.mulf %132, %136 : vector<8x32xf32>
    %138 = vector.broadcast %118 : vector<1x32xf32> to vector<8x32xf32>
    %139 = arith.mulf %137, %138 : vector<8x32xf32>
    %140 = vector.broadcast %119 : vector<1x32xf32> to vector<8x32xf32>
    %141 = arith.addf %139, %140 : vector<8x32xf32>
    %142 = arith.truncf %141 : vector<8x32xf32> to vector<8x32xbf16>
    %c0_41 = arith.constant 0 : index
    %c0_42 = arith.constant 0 : index
    %143 = vector.load %arg8[%c0_41, %c0_42] : memref<32x64xbf16, #tpu.memory_space<vmem>>, vector<32x64xbf16>
    %cst_43 = arith.constant dense<0.000000e+00> : vector<8x64xf32>
    %144 = tpu.matmul %142, %143, %cst_43 {dimension_numbers = #tpu.dot_dimension_numbers<[1], [0], [0], [1], [0, 0, 1, 1], [], []>} : vector<8x32xbf16>, vector<32x64xbf16>, vector<8x64xf32> -> vector<8x64xf32>
    %c0_44 = arith.constant 0 : index
    %c0_45 = arith.constant 0 : index
    %145 = vector.load %arg9[%c0_44, %c0_45] : memref<1x64xf32, #tpu.memory_space<vmem>>, vector<1x64xf32>
    %146 = vector.broadcast %145 : vector<1x64xf32> to vector<8x64xf32>
    %147 = arith.addf %144, %146 : vector<8x64xf32>
    %cst_46 = arith.constant 0.000000e+00 : f32
    %148 = vector.broadcast %cst_46 : f32 to vector<8x64xf32>
    %149 = arith.maximumf %147, %148 : vector<8x64xf32>
    %150 = arith.truncf %149 : vector<8x64xf32> to vector<8x64xbf16>
    %c0_47 = arith.constant 0 : index
    %c0_48 = arith.constant 0 : index
    %151 = vector.load %arg10[%c0_47, %c0_48] : memref<64x32xbf16, #tpu.memory_space<vmem>>, vector<64x32xbf16>
    %cst_49 = arith.constant dense<0.000000e+00> : vector<8x32xf32>
    %152 = tpu.matmul %150, %151, %cst_49 {dimension_numbers = #tpu.dot_dimension_numbers<[1], [0], [0], [1], [0, 0, 1, 1], [], []>} : vector<8x64xbf16>, vector<64x32xbf16>, vector<8x32xf32> -> vector<8x32xf32>
    %c0_50 = arith.constant 0 : index
    %c0_51 = arith.constant 0 : index
    %153 = vector.load %arg11[%c0_50, %c0_51] : memref<1x32xf32, #tpu.memory_space<vmem>>, vector<1x32xf32>
    %154 = vector.broadcast %153 : vector<1x32xf32> to vector<8x32xf32>
    %155 = arith.addf %152, %154 : vector<8x32xf32>
    %156 = arith.addf %141, %155 : vector<8x32xf32>
    %c0_52 = arith.constant 0 : index
    %c0_53 = arith.constant 0 : index
    %157 = vector.load %arg12[%c0_52, %c0_53] : memref<1x32xf32, #tpu.memory_space<vmem>>, vector<1x32xf32>
    %c0_54 = arith.constant 0 : index
    %c0_55 = arith.constant 0 : index
    %158 = vector.load %arg13[%c0_54, %c0_55] : memref<1x32xf32, #tpu.memory_space<vmem>>, vector<1x32xf32>
    %cst_56 = arith.constant dense<0.000000e+00> : vector<8xf32>
    %159 = vector.multi_reduction <add>, %156, %cst_56 [1] : vector<8x32xf32> to vector<8xf32>
    %160 = vector.shape_cast %159 : vector<8xf32> to vector<8x1xf32>
    %cst_57 = arith.constant 3.200000e+01 : f32
    %161 = vector.broadcast %cst_57 : f32 to vector<8x1xf32>
    %162 = arith.divf %160, %161 : vector<8x1xf32>
    %163 = vector.broadcast %162 : vector<8x1xf32> to vector<8x32xf32>
    %164 = arith.subf %156, %163 : vector<8x32xf32>
    %165 = arith.mulf %164, %164 : vector<8x32xf32>
    %cst_58 = arith.constant dense<0.000000e+00> : vector<8xf32>
    %166 = vector.multi_reduction <add>, %165, %cst_58 [1] : vector<8x32xf32> to vector<8xf32>
    %167 = vector.shape_cast %166 : vector<8xf32> to vector<8x1xf32>
    %cst_59 = arith.constant 3.200000e+01 : f32
    %168 = vector.broadcast %cst_59 : f32 to vector<8x1xf32>
    %169 = arith.divf %167, %168 : vector<8x1xf32>
    %170 = vector.broadcast %162 : vector<8x1xf32> to vector<8x32xf32>
    %171 = arith.subf %156, %170 : vector<8x32xf32>
    %cst_60 = arith.constant 9.99999974E-6 : f32
    %172 = vector.broadcast %cst_60 : f32 to vector<8x1xf32>
    %173 = arith.addf %169, %172 : vector<8x1xf32>
    %174 = math.rsqrt %173 : vector<8x1xf32>
    %175 = vector.broadcast %174 : vector<8x1xf32> to vector<8x32xf32>
    %176 = arith.mulf %171, %175 : vector<8x32xf32>
    %177 = vector.broadcast %157 : vector<1x32xf32> to vector<8x32xf32>
    %178 = arith.mulf %176, %177 : vector<8x32xf32>
    %179 = vector.broadcast %158 : vector<1x32xf32> to vector<8x32xf32>
    %180 = arith.addf %178, %179 : vector<8x32xf32>
    %181 = vector.shape_cast %180 : vector<8x32xf32> to vector<1x8x32xf32>
    %c0_61 = arith.constant 0 : index
    %c0_62 = arith.constant 0 : index
    %c0_63 = arith.constant 0 : index
    %182 = vector.load %arg14[%c0_61, %c0_62, %c0_63] : memref<1x8x32xf32, #tpu.memory_space<vmem>>, vector<1x8x32xf32>
    tpu.vector_store %arg14[%c0_61, %c0_62, %c0_63], %181 {strides = array<i32>} : memref<1x8x32xf32, #tpu.memory_space<vmem>>, vector<1x8x32xf32>,
    return
  }
  func.func @transform_0(%arg0: i32) -> (i32, i32, i32) {
    %c0_i32 = arith.constant 0 : i32
    %c0_i32_0 = arith.constant 0 : i32
    %c0_i32_1 = arith.constant 0 : i32
    return %arg0, %c0_i32, %c0_i32_0 : i32, i32, i32
  }
  func.func @transform_1(%arg0: i32) -> (i32, i32) {
    %c0_i32 = arith.constant 0 : i32
    %c0_i32_0 = arith.constant 0 : i32
    %c0_i32_1 = arith.constant 0 : i32
    return %c0_i32, %c0_i32_0 : i32, i32
  }
  func.func @transform_2(%arg0: i32) -> (i32, i32) {
    %c0_i32 = arith.constant 0 : i32
    %c0_i32_0 = arith.constant 0 : i32
    %c0_i32_1 = arith.constant 0 : i32
    return %c0_i32, %c0_i32_0 : i32, i32
  }
  func.func @transform_3(%arg0: i32) -> (i32, i32) {
    %c0_i32 = arith.constant 0 : i32
    %c0_i32_0 = arith.constant 0 : i32
    %c0_i32_1 = arith.constant 0 : i32
    return %c0_i32, %c0_i32_0 : i32, i32
  }
  func.func @transform_4(%arg0: i32) -> (i32, i32) {
    %c0_i32 = arith.constant 0 : i32
    %c0_i32_0 = arith.constant 0 : i32
    %c0_i32_1 = arith.constant 0 : i32
    return %c0_i32, %c0_i32_0 : i32, i32
  }
  func.func @transform_5(%arg0: i32) -> (i32, i32) {
    %c0_i32 = arith.constant 0 : i32
    %c0_i32_0 = arith.constant 0 : i32
    %c0_i32_1 = arith.constant 0 : i32
    return %c0_i32, %c0_i32_0 : i32, i32
  }
  func.func @transform_6(%arg0: i32) -> (i32, i32) {
    %c0_i32 = arith.constant 0 : i32
    %c0_i32_0 = arith.constant 0 : i32
    %c0_i32_1 = arith.constant 0 : i32
    return %c0_i32, %c0_i32_0 : i32, i32
  }
  func.func @transform_7(%arg0: i32) -> (i32, i32) {
    %c0_i32 = arith.constant 0 : i32
    %c0_i32_0 = arith.constant 0 : i32
    %c0_i32_1 = arith.constant 0 : i32
    return %c0_i32, %c0_i32_0 : i32, i32
  }
  func.func @transform_8(%arg0: i32) -> (i32, i32) {
    %c0_i32 = arith.constant 0 : i32
    %c0_i32_0 = arith.constant 0 : i32
    %c0_i32_1 = arith.constant 0 : i32
    return %c0_i32, %c0_i32_0 : i32, i32
  }
  func.func @transform_9(%arg0: i32) -> (i32, i32) {
    %c0_i32 = arith.constant 0 : i32
    %c0_i32_0 = arith.constant 0 : i32
    %c0_i32_1 = arith.constant 0 : i32
    return %c0_i32, %c0_i32_0 : i32, i32
  }
  func.func @transform_10(%arg0: i32) -> (i32, i32) {
    %c0_i32 = arith.constant 0 : i32
    %c0_i32_0 = arith.constant 0 : i32
    %c0_i32_1 = arith.constant 0 : i32
    return %c0_i32, %c0_i32_0 : i32, i32
  }
  func.func @transform_11(%arg0: i32) -> (i32, i32) {
    %c0_i32 = arith.constant 0 : i32
    %c0_i32_0 = arith.constant 0 : i32
    %c0_i32_1 = arith.constant 0 : i32
    return %c0_i32, %c0_i32_0 : i32, i32
  }
  func.func @transform_12(%arg0: i32) -> (i32, i32) {
    %c0_i32 = arith.constant 0 : i32
    %c0_i32_0 = arith.constant 0 : i32
    %c0_i32_1 = arith.constant 0 : i32
    return %c0_i32, %c0_i32_0 : i32, i32
  }
  func.func @transform_13(%arg0: i32) -> (i32, i32, i32) {
    %c0_i32 = arith.constant 0 : i32
    %c0_i32_0 = arith.constant 0 : i32
    %c0_i32_1 = arith.constant 0 : i32
    return %arg0, %c0_i32, %c0_i32_0 : i32, i32, i32
  }
}

</mosaic_0001>

<bundles_post_ra>
// kernel: tpu_custom_call.1
= control target key start
LH: loop header
LB: loop body
LE: loop exit
PB: predicated region body
PF: predicated region fallthrough
CT: control target
= control target key end

     0   :  { %s2084_s0 = inlined_call_operand.vmem [shape: f32[2,8,32], index: 0, kind: input, shape index: {}]   ;;  %s2085_s1 = inlined_call_operand.vmem [shape: bf16[32,96], index: 1, kind: input, shape index: {}]   ;;  %s2086_s2 = inlined_call_operand.vmem [shape: bf16[32,32], index: 2, kind: input, shape index: {}]   ;;  %s2087_s3 = inlined_call_operand.vmem [shape: f32[1,32], index: 3, kind: input, shape index: {}]   ;;  %s2088_s4 = inlined_call_operand.vmem [shape: f32[1,32], index: 4, kind: input, shape index: {}]   ;;  %s2089_s5 = inlined_call_operand.vmem [shape: f32[1,32], index: 5, kind: input, shape index: {}]   ;;  %s2090_s6 = inlined_call_operand.vmem [shape: f32[1,32], index: 6, kind: input, shape index: {}]   ;;  %s2091_s7 = inlined_call_operand.hbm [shape: bf16[32,64], index: 7, kind: input, shape index: {}]   ;;  %s2092_s8 = inlined_call_operand.vmem [shape: f32[1,64], index: 8, kind: input, shape index: {}]   ;;  %s2093_s9 = inlined_call_operand.vmem [shape: bf16[64,32], index: 9, kind: input, shape index: {}]   ;;  %s2094_s10 = inlined_call_operand.vmem [shape: f32[1,32], index: 10, kind: input, shape index: {}]   ;;  %s2095_s11 = inlined_call_operand.vmem [shape: f32[1,32], index: 11, kind: input, shape index: {}]   ;;  %s2096_s12 = inlined_call_operand.vmem [shape: f32[1,32], index: 12, kind: input, shape index: {}]   ;;  %s2097_s13 = inlined_call_operand.hbm [shape: f32[2,8,32], index: 13, kind: output, shape index: {}]  }
   0x1   :  { %2104 = sst [smem:[#allocation11_spill]] %s2084_s0 }
   0x2   :  { %18 = vsyncpa [#allocation3], 0 }
   0x3   :  { %19 = vsyncpa [#allocation4], 0 }
   0x4   :  { %21 = vsyncpa [#allocation4 + $0x1], 0  ;;  %s1804_s25 = smov 0   ;;  %s1806_s26 = smov 0  }
   0x5   :  { %s1808_s27 = smov 0   ;;  %s1810_s28 = smov 0  }
   0x6 LB: > { %2105 = sst [smem:[#allocation8_spill]] %s1708_s27  ;;  %s1825_s29 = sadd.s32 4294967295, %s1712_s28   ;;  %s1712_s28 = sphi %s1810_s28, %s2118_s28   ;;  %s1708_s27 = sphi %s1808_s27, %s2120_s27   ;;  %s1704_s26 = sphi %s1806_s26, %s2122_s26   ;;  %s1700_s25 = sphi %s1804_s25, %s2121_s25  }
   0x7   : > { %s1362_s30 = sadd.s32 4294967294, %s1712_s28   ;;  %s1829_s14 = sadd.s32 1, %s1712_s28  }
   0x8   : > { %2106 = sst [smem:[#allocation9_spill]] %s1829_s14  ;;  %s312_s15 = sadd.s32 1, %s1708_s27 }
   0x9   : > { %s309_s16 = ssub.s32 %s1712_s28, %s1829_s14  ;;  %p322_p0 = scmp.ne.s32.totalorder %s1708_s27, %s1704_s26 }
   0xa   : > { %p310_p1 = scmp.eq.s32.totalorder %s309_s16, 0  ;;  %p323_p2 = scmp.eq.s32.totalorder %s1825_s29, 1 }
   0xb   : > { %p328_p3 = scmp.ne.s32.totalorder %s1704_s26, %s1700_s25  ;;  %p329_p4 = scmp.eq.s32.totalorder %s1362_s30, 1 }
   0xc   : > { %s1840_s17 = scalar_select %p310_p1, %s1708_s27, %s312_s15  }
   0xd   : > { %p1842_p5 = por %p323_p2, %p322_p0  ;;  %p1846_p6 = por %p329_p4, %p328_p3 }
   0xe   : > { %2107 = sst [smem:[#allocation10_spill]] %s1840_s17  ;;  %p1363_p7 = scmp.ge.s32.totalorder %s1712_s28, 1 }
   0xf   : > { %s2108_s18 = scalar_select %p1842_p5, 1, 0 }
  0x10   : > { %s2109_s19 = scalar_select %p1846_p6, 1, 0 }
  0x11   : > { %p336_p8 = scmp.lt.s32.totalorder %s1712_s28, 3  ;;  %p2101_p9 = scmp.eq.s32.totalorder %s1825_s29, 0 }
  0x12   : > { %s1714_s21 = smov [#allocation2]   ;;  %s1618_s15 = scalar_lea.hbm %s2091_s7, 256 }
  0x13   : > { %p1853_p10 = pnand %p1363_p7, %p336_p8  ;;  %s366_s22 = sshll.u32 %s1714_s21, 4  ;;  %s367_s22 = int_to_ptr.vmem [resolvable:$true] %s366_s22 }
  0x14   : > { %p1619_p13 = scmp.ne.s32.totalorder %s2091_s7, %s1618_s15  ;;  %p1625_p3 = scmp.lt.u32.totalorder %s1618_s15, %s2091_s7 }
  0x15   : > { %s2110_s20 = scalar_select %p1853_p10, 1, 0 }
  0x16   : > { %p1524_p11 = pneg %p1853_p10 }
  0x18   : > { %p1861_p12 = pnand %p2101_p9, %p1524_p11 }
  0x1a   : > { %p1620_p0 = pneg %p1861_p12 }
  0x1c   : > { %p1621_p1 = pnand %p1620_p0, %p1619_p13 }
  0x1e   : > { %p1622_p2 = pneg %p1621_p1 }
  0x20   : > { %p1627_p4 = pnand %p1625_p3, %p1622_p2 }
  0x22   : > { %1630 = shalt.err (!%p1627_p4)
}
  0x23   : > { %s1631_s14 = scalar_lea.vmem %s367_s22, 256  ;;  %p1639_p9 = scmp.lt.s32.totalorder %s367_s22, %s367_s22 }
  0x24   : > { %p1632_p7 = scmp.ne.s32.totalorder %s367_s22, %s1631_s14  ;;  %p1640_p6 = scmp.lt.s32.totalorder %s1631_s14, %s1631_s14 }
  0x26   : > { %p1634_p8 = pnand %p1632_p7, %p1620_p0  ;;  %p1641_p5 = por %p1640_p6, %p1639_p9 }
  0x28   : > { %p1635_p11 = pneg %p1634_p8 }
  0x2a   : > { %p1642_p10 = pnand %p1641_p5, %p1635_p11 }
  0x2c   : > { %1645 = shalt.err (!%p1642_p10)
}
  0x2d   : > { %s1715_s17 = smov 64   ;;  %s1716_s24 = smov 4  }
  0x2e   : > { %1527 = dma.hbm_to_vmem [thread:$0]  (!%p1861_p12), %s2091_s7, 256, %s367_s22, [#allocation3], %s1715_s17, %s1715_s17, %s1716_s24  }
  0x2f   : > { %p2112_p13 = scmp.ne.s32.totalorder %s2110_s20, 0 }
  0x30   : > { %p2113_p1 = scmp.eq.s32.totalorder (!%p2112_p13), %s1825_s29, 0 }
  0x31   : > { %404 = sbr.rel (%p2112_p13) target bundleno = 2766 (0xace), region = 72 }
  0x38   : > { %1691 = dma.done.wait (%p2113_p1), [#allocation3], 256   ;;  %p2114_p0 = pmov %p2113_p1 }
  0x39   : > { %p447_p5 = scmp.lt.s32.totalorder %s1825_s29, 1  ;;  %v1717_v0 = vmov 0.0   ;;  %vm1718_vm0 = vmmov 0   ;;  %s2115_s0 = sld [smem:[#allocation11_spill]]  ;;  %v1586_v1 = vld [vmem:[%s2085_s1] sm:$0xff]   ;;  %v1587_v2 = vld [vmem:[%s2085_s1 + $0x8] sm:$0xff]  }
  0x3a   : > { %1693 = vsyncadd (%p2114_p0), [#allocation3], 4294967040  ;;  %1434 = vmatprep.subr.bf16.mxu0 %v1717_v0  ;;  %1438 = vmatprep.mubr.msk.bf16.mxu0 %vm1718_vm0, %v1717_v0  ;;  %vm470_vm1 = vcmask 261120   ;;  %s1719_s30 = smov 120   ;;  %s1720_s16 = smov 96   ;;  %vm518_vm2 = vcmask 64512  }
  0x3b   : > { %s448_s27 = scalar_select %p447_p5, %s1825_s29, 1  ;;  %1442 = vmatprep.subr.bf16.mxu1 %v1717_v0  ;;  %1444 = vmatprep.mubr.msk.bf16.mxu1 %vm1718_vm0, %v1717_v0  ;;  %vm580_vm3 = vcmask 1043456   ;;  %vm969_vm4 = vcmask 130048   ;;  %vm971_vm5 = vcmask 195584   ;;  %vm1202_vm6 = vcmask 523264  }
  0x3c   : > { %1435 = vmatpush3.bf16.msra.mxu0 %v1586_v1  ;;  %s1723_s20 = smov 72   ;;  %s1724_s22 = smov 112  }
  0x3d   : > { %s1369_s14 = sshll.u32 %s448_s27, 3  ;;  %1436 = vmatprep.subr.bf16.mxu0 %v1717_v0  ;;  %s1721_s27 = smov 80  }
  0x3e   : > { %s1726_s15 = smov 56   ;;  %s1727_s21 = smov 64  }
  0x3f   : > { %s450_s23 = scalar_lea.vmem %s2115_s0, %s1369_s14  ;;  %s1722_s14 = smov 88  }
  0x40   : > { %v1904_v3 = vld [vmem:[%s450_s23] sm:$0xff]  ;;  %1437 = vmatpush3.bf16.msra.mxu0 %v1587_v2  ;;  %s1725_s23 = smov 104   ;;  %s1728_s17 = smov 40  }
  0x41   : > { %v453_v4 = vpack.c.bf16 %v1904_v3, %v1904_v3  ;;  %1448 = vmatprep.subr.bf16.mxu0 %v1717_v0  ;;  %s1729_s24 = smov 48   ;;  %p2116_p9 = scmp.ne.s32.totalorder %s2108_s18, 0 }
  0x43   : > { %1439 = vmatmul.mubr.msk.bf16.vlgmr.msra.gmra.mrb[0].mxu0 %vm470_vm1, %v453_v4 }
  0x44   : > { %1450 = vmatprep.mubr.msk.bf16.mxu0 %vm1718_vm0, %v1717_v0 }
 0x116   : > { %v508_v5 = vpop.f32.mrb[0].mxu0 }
 0x117   : > { %v1913_v6 = vpack.c.bf16 %v508_v5, %v508_v5  ;;  %v1440_v7 = vpop.f32.mrb[1].mxu0 }
 0x118   : > { %v511_v8 = vpop.f32.mrb[2].mxu0 }
 0x119   : > { %626 = vrot.lane.b32.xlu1 %v1913_v6, %s1719_s30  ;;  %516 = vrot.lane.b32.xlu0 %v1913_v6, %s1720_s16  ;;  %v1441_v9 = vpop.f32.mrb[3].mxu0  ;;  %s1730_s30 = smov 8  }
 0x11d   : > { %738 = vrot.lane.b32.xlu1 %v1913_v6, %s1721_s27  ;;  %628 = vrot.lane.b32.xlu0 %v1913_v6, %s1722_s14 }
 0x121   : > { %848 = vrot.lane.b32.xlu1 %v1913_v6, %s1723_s20  ;;  %736 = vrot.lane.b32.xlu0 %v1913_v6, %s1724_s22  ;;  %s1731_s22 = smov 16  }
 0x125   : > { %846 = vrot.lane.b32.xlu0 %v1913_v6, %s1725_s23  ;;  %s1732_s23 = smov 24  }
 0x18b   : > { %v517_v10 = vpop.permute.xlu0 %516  ;;  %v627_v13 = vpop.permute.xlu1 %626 }
 0x18c   : > { %v523_v11 = vsel %vm518_vm2, %v517_v10, 0 }
 0x18d   : > { %1443 = vmatpush3.bf16.xpose.msra.mxu1 %v523_v11 }
 0x18e   : > { %1454 = vmatprep.subr.bf16.mxu1 %v1717_v0 }
 0x18f   : > { %v629_v12 = vpop.permute.xlu0 %628  ;;  %v739_v15 = vpop.permute.xlu1 %738 }
 0x190   : > { %v634_v14 = vsel %vm518_vm2, %v629_v12, 0  ;;  %v744_v16 = vsel %vm518_vm2, %v739_v15, 0 }
 0x193   : > { %v849_v17 = vpop.permute.xlu1 %848  ;;  %v737_v18 = vpop.permute.xlu0 %736 }
 0x194   : > { %1445 = vmatmul.mubr.msk.bf16.vlgmr.msra.gmra.mrb[0].mxu1 %vm518_vm2, %v1913_v6  ;;  %v854_v19 = vsel %vm518_vm2, %v849_v17, 0 }
 0x195   : > { %1455 = vmatpush3.bf16.xpose.msra.mxu1 %v634_v14  ;;  %1456 = vmatprep.mubr.msk.bf16.mxu1 %vm1718_vm0, %v1717_v0 }
 0x196   : > { %1466 = vmatprep.subr.bf16.mxu1 %v1717_v0 }
 0x197   : > { %v847_v20 = vpop.permute.xlu0 %846 }
 0x19c   : > { %1457 = vmatmul.mubr.msk.bf16.vlgmr.msra.gmra.mrb[4].mxu1 %vm518_vm2, %v627_v13 }
 0x19d   : > { %1467 = vmatpush3.bf16.xpose.msra.mxu1 %v744_v16  ;;  %1468 = vmatprep.mubr.msk.bf16.mxu1 %vm1718_vm0, %v1717_v0 }
 0x19e   : > { %1478 = vmatprep.subr.bf16.mxu1 %v1717_v0 }
 0x1a4   : > { %1469 = vmatmul.mubr.msk.bf16.vlgmr.msra.gmra.mrb[8].mxu1 %vm518_vm2, %v737_v18 }
 0x1a5   : > { %1479 = vmatpush3.bf16.xpose.msra.mxu1 %v854_v19  ;;  %1480 = vmatprep.mubr.msk.bf16.mxu1 %vm1718_vm0, %v1717_v0 }
 0x1a6   : > { %1490 = vmatprep.subr.bf16.mxu1 %v1717_v0 }
 0x1ac   : > { %1481 = vmatmul.mubr.msk.bf16.vlgmr.msra.gmra.mrb[12].mxu1 %vm518_vm2, %v847_v20 }
 0x1ad   : > { %1494 = vmatprep.mubr.msk.bf16.mxu1 %vm1718_vm0, %v1717_v0 }
 0x267   : > { %v559_v21 = vpop.f32.mrb[0].mxu1 }
 0x268   : > { %v1446_v22 = vpop.f32.mrb[1].mxu1  ;;  %v565_v23 = vsel %vm518_vm2, %v559_v21, -inf }
 0x269   : > { %566 = vmax.xlane.f32.xlu1 %v565_v23  ;;  %v562_v24 = vpop.f32.mrb[2].mxu1  ;;  %v1588_v23 = vld [vmem:[%s2086_s2] sm:$0xff]  }
 0x26a   : > { %v1447_v25 = vpop.f32.mrb[3].mxu1  ;;  %1491 = vmatpush3.bf16.msra.mxu1 %v1588_v23 }
 0x26b   : > { %1492 = vmatprep.subr.bf16.mxu1 %v1717_v0  ;;  %v1589_v25 = vld [vmem:[%s2086_s2 + $0x8] sm:$0xff]  }
 0x26e   : > { %1493 = vmatpush3.bf16.msra.mxu1 %v1589_v25 }
 0x26f   : > { %v670_v26 = vpop.f32.mrb[4].mxu1  ;;  %1506 = vmatprep.subr.bf16.mxu1 %v1717_v0 }
 0x270   : > { %v1458_v27 = vpop.f32.mrb[5].mxu1  ;;  %v676_v28 = vsel %vm518_vm2, %v670_v26, -inf }
 0x271   : > { %677 = vmax.xlane.f32.xlu0 %v676_v28  ;;  %v673_v29 = vpop.f32.mrb[6].mxu1 }
 0x272   : > { %v1459_v30 = vpop.f32.mrb[7].mxu1 }
 0x277   : > { %v780_v31 = vpop.f32.mrb[8].mxu1 }
 0x278   : > { %v1470_v32 = vpop.f32.mrb[9].mxu1  ;;  %v786_v33 = vsel %vm518_vm2, %v780_v31, -inf }
 0x279   : > { %787 = vmax.xlane.f32.xlu0 %v786_v33  ;;  %v783_v34 = vpop.f32.mrb[10].mxu1 }
 0x27a   : > { %686 = vrot.lane.b32.xlu1 %v1913_v6, %s1726_s15  ;;  %v1471_v35 = vpop.f32.mrb[11].mxu1 }
 0x27f   : > { %v890_v36 = vpop.f32.mrb[12].mxu1 }
 0x280   : > { %v1482_v37 = vpop.f32.mrb[13].mxu1  ;;  %v896_v40 = vsel %vm518_vm2, %v890_v36, -inf }
 0x281   : > { %v893_v38 = vpop.f32.mrb[14].mxu1 }
 0x282   : > { %v1483_v39 = vpop.f32.mrb[15].mxu1 }
 0x28f   : > { %575 = vrot.lane.b32.xlu0 %v1913_v6, %s1727_s21 }
 0x293   : > { %906 = vrot.lane.b32.xlu0 %v1913_v6, %s1728_s17 }
 0x29e   : > { %897 = vmax.xlane.f32.xlu1 %v896_v40 }
 0x2af   : > { %796 = vrot.lane.b32.xlu1 %v1913_v6, %s1729_s24 }
 0x2f6   : > { %v567_v41 = vpop.xlane.xlu1 %566 }
 0x2f7   : > { %v568_v42 = vsub.f32 %v559_v21, %v567_v41 }
 0x2f9   : > { %v569_v43 = vmul.f32 1.442695, %v568_v42 }
 0x2fa   : > { %v687_v53 = vpop.permute.xlu1 %686 }
 0x2fb   : > { %1596 = vpow2.f32 %v569_v43  ;;  %v692_v57 = vsel %vm580_vm3, %v687_v53, 0 }
 0x2fe   : > { %v678_v44 = vpop.xlane.xlu0 %677 }
 0x2ff   : > { %v679_v45 = vsub.f32 %v670_v26, %v678_v44 }
 0x301   : > { %v680_v46 = vmul.f32 1.442695, %v679_v45 }
 0x303   : > { %1598 = vpow2.f32 %v680_v46 }
 0x305   : > { %v1597_v50 = vpop.eup %1596 }
 0x306   : > { %v788_v47 = vpop.xlane.xlu0 %787  ;;  %v574_v55 = vpack.c.bf16 %v1597_v50, %v1597_v50  ;;  %v571_v58 = vsel %vm518_vm2, %v1597_v50, 0.0 }
 0x307   : > { %v789_v48 = vsub.f32 %v780_v31, %v788_v47 }
 0x309   : > { %v790_v49 = vmul.f32 1.442695, %v789_v48 }
 0x30a   : > { %v576_v51 = vpop.permute.xlu0 %575 }
 0x30b   : > { %1600 = vpow2.f32 %v790_v49  ;;  %v582_v52 = vsel %vm580_vm3, %v576_v51, 0 }
 0x30c   : > { %1449 = vmatpush3.bf16.msra.mxu0 %v582_v52 }
 0x30d   : > { %v1599_v54 = vpop.eup %1598  ;;  %1460 = vmatprep.subr.bf16.mxu0 %v1717_v0 }
 0x30e   : > { %v682_v56 = vsel %vm518_vm2, %v1599_v54, 0.0  ;;  %v685_v60 = vpack.c.bf16 %v1599_v54, %v1599_v54  ;;  %v907_v5 = vpop.permute.xlu0 %906 }
 0x30f   : > { %683 = vadd.xlane.f32.xlu1 %v682_v56  ;;  %1451 = vmatmul.mubr.msk.bf16.vlgmr.msra.gmra.mrb[4].mxu0 %vm518_vm2, %v574_v55  ;;  %v912_v7 = vsel %vm580_vm3, %v907_v5, 0 }
 0x310   : > { %1461 = vmatpush3.bf16.msra.mxu0 %v692_v57  ;;  %1462 = vmatprep.mubr.msk.bf16.mxu0 %vm1718_vm0, %v1717_v0 }
 0x311   : > { %1472 = vmatprep.subr.bf16.mxu0 %v1717_v0 }
 0x313   : > { %572 = vadd.xlane.f32.xlu1 %v571_v58 }
 0x315   : > { %v1601_v59 = vpop.eup %1600 }
 0x316   : > { %v792_v61 = vsel %vm518_vm2, %v1601_v59, 0.0  ;;  %v795_v6 = vpack.c.bf16 %v1601_v59, %v1601_v59 }
 0x317   : > { %793 = vadd.xlane.f32.xlu0 %v792_v61  ;;  %1463 = vmatmul.mubr.msk.bf16.vlgmr.msra.gmra.mrb[8].mxu0 %vm518_vm2, %v685_v60 }
 0x318   : > { %1474 = vmatprep.mubr.msk.bf16.mxu0 %vm1718_vm0, %v1717_v0 }
 0x32b   : > { %v898_v62 = vpop.xlane.xlu1 %897 }
 0x32c   : > { %v899_v63 = vsub.f32 %v890_v36, %v898_v62 }
 0x32e   : > { %v900_v1 = vmul.f32 1.442695, %v899_v63  ;;  %v1384_v63 = vld [vmem:[%s2087_s3] ss:$0 sm:$0xff] }
 0x32f   : > { %v797_v2 = vpop.permute.xlu1 %796 }
 0x330   : > { %1602 = vpow2.f32 %v900_v1  ;;  %v802_v4 = vsel %vm580_vm3, %v797_v2, 0  ;;  %v1385_v2 = vld [vmem:[%s2088_s4] ss:$0 sm:$0xff] }
 0x331   : > { %1473 = vmatpush3.bf16.msra.mxu0 %v802_v4 }
 0x332   : > { %1484 = vmatprep.subr.bf16.mxu0 %v1717_v0 }
 0x334   : > { %1475 = vmatmul.mubr.msk.bf16.vlgmr.msra.gmra.mrb[12].mxu0 %vm518_vm2, %v795_v6 }
 0x335   : > { %1485 = vmatpush3.bf16.msra.mxu0 %v912_v7  ;;  %1486 = vmatprep.mubr.msk.bf16.mxu0 %vm1718_vm0, %v1717_v0 }
 0x336   : > { %1498 = vmatprep.subr.bf16.mxu0 %v1717_v0 }
 0x33a   : > { %v1603_v8 = vpop.eup %1602 }
 0x33b   : > { %v902_v9 = vsel %vm518_vm2, %v1603_v8, 0.0  ;;  %v905_v10 = vpack.c.bf16 %v1603_v8, %v1603_v8 }
 0x33c   : > { %903 = vadd.xlane.f32.xlu0 %v902_v9 }
 0x33d   : > { %1487 = vmatmul.mubr.msk.bf16.vlgmr.msra.gmra.mrb[16].mxu0 %vm518_vm2, %v905_v10 }
 0x33e   : > { %1502 = vmatprep.mubr.msk.bf16.mxu0 %vm1718_vm0, %v1717_v0 }
 0x39c   : > { %v684_v11 = vpop.xlane.xlu1 %683 }
 0x39d   : > { %1604 = vrcp.f32 %v684_v11 }
 0x3a0   : > { %v573_v38 = vpop.xlane.xlu1 %572 }
 0x3a4   : > { %v794_v22 = vpop.xlane.xlu0 %793 }
 0x3a5   : > { %1606 = vrcp.f32 %v794_v22  ;;  %v1387_v22 = vld [vmem:[%s2090_s6] ss:$0 sm:$0xff] }
 0x3a7   : > { %v1605_v16 = vpop.eup %1604 }
 0x3af   : > { %v1607_v26 = vpop.eup %1606 }
 0x3c9   : > { %v904_v24 = vpop.xlane.xlu0 %903 }
 0x3ca   : > { %1608 = vrcp.f32 %v904_v24 }
 0x3cb   : > { %1610 = vrcp.f32 %v573_v38 }
 0x3d4   : > { %v1609_v32 = vpop.eup %1608 }
 0x3d5   : > { %v1611_v39 = vpop.eup %1610 }
 0x3e2   : > { %v618_v12 = vpop.f32.mrb[4].mxu0 }
 0x3e3   : > { %v1452_v13 = vpop.f32.mrb[5].mxu0  ;;  %v625_v42 = vmul.f32 %v1611_v39, %v618_v12 }
 0x3e4   : > { %v621_v14 = vpop.f32.mrb[6].mxu0  ;;  %v1590_v13 = vld [vmem:[#allocation2] sm:$0xff]  }
 0x3e5   : > { %v1453_v15 = vpop.f32.mrb[7].mxu0  ;;  %1499 = vmatpush3.bf16.msra.mxu0 %v1590_v13  ;;  %v1591_v14 = vld [vmem:[#allocation2 + $0x8] sm:$0xff]  }
 0x3e6   : > { %1500 = vmatprep.subr.bf16.mxu0 %v1717_v0  ;;  %v1593_v15 = vld [vmem:[%s2093_s9 + $0x8] sm:$0xff]  }
 0x3e9   : > { %1501 = vmatpush3.bf16.msra.mxu0 %v1591_v14 }
 0x3ea   : > { %v728_v17 = vpop.f32.mrb[8].mxu0 }
 0x3eb   : > { %v735_v18 = vmul.f32 %v1605_v16, %v728_v17  ;;  %v1464_v19 = vpop.f32.mrb[9].mxu0 }
 0x3ec   : > { %v731_v20 = vpop.f32.mrb[10].mxu0 }
 0x3ed   : > { %957 = vrot.lane.b32.xlu0 %v735_v18, %s1730_s30  ;;  %v1465_v21 = vpop.f32.mrb[11].mxu0  ;;  %v1386_v20 = vld [vmem:[%s2089_s5] ss:$0 sm:$0xff]  ;;  %s1401_s30 = sshll.u32 %s1825_s29, 7  ;;  %s1733_s29 = smov [#allocation5]  }
 0x3ee   : > { %s2041_s0 = scalar_lea.hbm %s2097_s13, %s1401_s30 }
 0x407   : > { %v838_v27 = vpop.f32.mrb[12].mxu0 }
 0x408   : > { %v845_v28 = vmul.f32 %v1607_v26, %v838_v27  ;;  %v1476_v29 = vpop.f32.mrb[13].mxu0  ;;  %v1594_v26 = vld [vmem:[%s2093_s9 + $0x10] sm:$0xff]   ;;  %v1595_v27 = vld [vmem:[%s2093_s9 + $0x18] sm:$0xff]  }
 0x409   : > { %v841_v30 = vpop.f32.mrb[14].mxu0 }
 0x40a   : > { %961 = vrot.lane.b32.xlu1 %v845_v28, %s1731_s22  ;;  %v1477_v31 = vpop.f32.mrb[15].mxu0  ;;  %v1388_v28 = vld [vmem:[%s2092_s8] ss:$0 sm:$0xff]  ;;  %s444_s22 = sand.u32 1, %s1704_s26  }
 0x40b   : > { %s1278_s15 = scalar_lea.sflag [#allocation4], %s444_s22 }
 0x410   : > { %v948_v33 = vpop.f32.mrb[16].mxu0 }
 0x411   : > { %v955_v34 = vmul.f32 %v1609_v32, %v948_v33  ;;  %v1488_v35 = vpop.f32.mrb[17].mxu0 }
 0x412   : > { %v951_v36 = vpop.f32.mrb[18].mxu0 }
 0x413   : > { %965 = vrot.lane.b32.xlu1 %v955_v34, %s1732_s23  ;;  %v1489_v37 = vpop.f32.mrb[19].mxu0  ;;  %s1368_s23 = sshll.u32 %s444_s22, 3 }
 0x414   : > { %s446_s16 = scalar_lea.vmem [#allocation5], %s1368_s23  ;;  %s1650_s23 = sshll.u32 %s1733_s29, 4  ;;  %s1651_s23 = int_to_ptr.vmem [resolvable:$false] %s1650_s23 }
 0x415   : > { %s1291_s27 = sshll.u32 %s446_s16, 4  ;;  %s1652_s17 = scalar_lea.vmem %s1651_s23, 256  ;;  %s2043_s27 = int_to_ptr.vmem [resolvable:$true] %s1291_s27 }
 0x416   : > { %s1646_s21 = scalar_lea.vmem %s2043_s27, 128  ;;  %p1653_p2 = scmp.lt.s32.totalorder %s2043_s27, %s1651_s23 }
 0x417   : > { %p1647_p6 = scmp.ne.s32.totalorder %s2043_s27, %s1646_s21  ;;  %p1654_p3 = scmp.lt.s32.totalorder %s1652_s17, %s1646_s21 }
 0x419   : > { %p1648_p10 = pnand %p1647_p6, %p2116_p9  ;;  %p1655_p4 = por %p1654_p3, %p1653_p2 }
 0x41b   : > { %p1649_p12 = pneg %p1648_p10 }
 0x41d   : > { %p1656_p7 = pnand %p1655_p4, %p1649_p12 }
 0x45f   : > { %v958_v40 = vpop.permute.xlu0 %957 }
 0x460   : > { %v968_v43 = vsel %vm518_vm2, %v625_v42, %v958_v40 }
 0x47c   : > { %v962_v41 = vpop.permute.xlu1 %961 }
 0x47d   : > { %v970_v44 = vsel %vm969_vm4, %v968_v43, %v962_v41 }
 0x485   : > { %v966_v45 = vpop.permute.xlu1 %965 }
 0x486   : > { %v972_v46 = vsel %vm971_vm5, %v970_v44, %v966_v45 }
 0x487   : > { %v973_v47 = vpack.c.bf16 %v972_v46, %v972_v46 }
 0x489   : > { %1495 = vmatmul.mubr.msk.bf16.vlgmr.msra.gmra.mrb[16].mxu1 %vm470_vm1, %v973_v47 }
 0x48a   : > { %1514 = vmatprep.mubr.msk.bf16.mxu1 %vm1718_vm0, %v1717_v0 }
 0x55c   : > { %v1027_v48 = vpop.f32.mrb[16].mxu1 }
 0x55d   : > { %v1033_v49 = vadd.f32 %v1027_v48, %v1904_v3  ;;  %v1496_v50 = vpop.f32.mrb[17].mxu1 }
 0x55e   : > { %v1030_v51 = vpop.f32.mrb[18].mxu1 }
 0x55f   : > { %v1497_v52 = vpop.f32.mrb[19].mxu1  ;;  %v1036_v53 = vsel %vm470_vm1, %v1033_v49, 0.0 }
 0x560   : > { %1037 = vadd.xlane.f32.xlu0 %v1036_v53  ;;  %v1398_v52 = vld [vmem:[%s2095_s11] ss:$0 sm:$0xff] }
 0x5ed   : > { %v1038_v54 = vpop.xlane.xlu0 %1037 }
 0x5ee   : > { %v1040_v55 = vmul.f32 0.03125, %v1038_v54  ;;  %v1399_v54 = vld [vmem:[%s2096_s12] ss:$0 sm:$0xff] }
 0x5f0   : > { %v1041_v56 = vsub.f32 %v1033_v49, %v1040_v55 }
 0x5f2   : > { %v1042_v57 = vmul.f32 %v1041_v56, %v1041_v56 }
 0x5f4   : > { %v1043_v58 = vsel %vm470_vm1, %v1042_v57, 0.0 }
 0x5f5   : > { %1044 = vadd.xlane.f32.xlu1 %v1043_v58 }
 0x682   : > { %v1045_v59 = vpop.xlane.xlu1 %1044 }
 0x683   : > { %v1046_v60 = vmul.f32 0.03125, %v1045_v59 }
 0x685   : > { %v1047_v61 = vadd.f32 1e-06, %v1046_v60 }
 0x687   : > { %1612 = vrsqrt.f32 %v1047_v61 }
 0x691   : > { %v1613_v62 = vpop.eup %1612 }
 0x692   : > { %v1049_v1 = vmul.f32 %v1613_v62, %v1041_v56 }
 0x694   : > { %v1056_v4 = vmul.f32 %v1384_v63, %v1049_v1 }
 0x696   : > { %v1063_v5 = vadd.f32 %v1385_v2, %v1056_v4 }
 0x698   : > { %v1064_v6 = vadd.f32 %v1063_v5, %v1904_v3  ;;  %v1592_v3 = vld [vmem:[%s2093_s9] sm:$0xff]  }
 0x699   : > { %1507 = vmatpush3.bf16.msra.mxu1 %v1592_v3 }
 0x69a   : > { %v1067_v7 = vsel %vm470_vm1, %v1064_v6, 0.0  ;;  %1508 = vmatprep.subr.bf16.mxu1 %v1717_v0 }
 0x69b   : > { %1068 = vadd.xlane.f32.xlu0 %v1067_v7 }
 0x69d   : > { %1509 = vmatpush3.bf16.msra.mxu1 %v1593_v15 }
 0x69e   : > { %1510 = vmatprep.subr.bf16.mxu1 %v1717_v0 }
 0x6a1   : > { %1511 = vmatpush3.bf16.msra.mxu1 %v1594_v26 }
 0x6a2   : > { %1512 = vmatprep.subr.bf16.mxu1 %v1717_v0  ;;  %v1392_v0 = vld [vmem:[%s2094_s10] ss:$0 sm:$0xff] }
 0x6a5   : > { %1513 = vmatpush3.bf16.msra.mxu1 %v1595_v27 }
 0x728   : > { %v1069_v8 = vpop.xlane.xlu0 %1068 }
 0x729   : > { %v1070_v9 = vmul.f32 0.03125, %v1069_v8 }
 0x72b   : > { %v1071_v10 = vsub.f32 %v1064_v6, %v1070_v9 }
 0x72d   : > { %v1072_v11 = vmul.f32 %v1071_v10, %v1071_v10 }
 0x72f   : > { %v1073_v12 = vsel %vm470_vm1, %v1072_v11, 0.0 }
 0x730   : > { %1074 = vadd.xlane.f32.xlu0 %v1073_v12 }
 0x7bd   : > { %v1075_v16 = vpop.xlane.xlu0 %1074 }
 0x7be   : > { %v1076_v17 = vmul.f32 0.03125, %v1075_v16 }
 0x7c0   : > { %v1077_v18 = vadd.f32 1e-05, %v1076_v17 }
 0x7c2   : > { %1614 = vrsqrt.f32 %v1077_v18 }
 0x7cc   : > { %v1615_v19 = vpop.eup %1614 }
 0x7cd   : > { %v1079_v21 = vmul.f32 %v1615_v19, %v1071_v10 }
 0x7cf   : > { %v1086_v23 = vmul.f32 %v1386_v20, %v1079_v21 }
 0x7d1   : > { %v1093_v24 = vadd.f32 %v1387_v22, %v1086_v23 }
 0x7d3   : > { %v1094_v25 = vpack.c.bf16 %v1093_v24, %v1093_v24 }
 0x7d5   : > { %1503 = vmatmul.mubr.msk.bf16.vlgmr.msra.gmra.mrb[20].mxu0 %vm470_vm1, %v1094_v25 }
 0x8a8   : > { %v1155_v29 = vpop.f32.mrb[20].mxu0 }
 0x8a9   : > { %v1156_v30 = vadd.f32 %v1388_v28, %v1155_v29  ;;  %v1504_v31 = vpop.f32.mrb[21].mxu0 }
 0x8aa   : > { %v1158_v32 = vpop.f32.mrb[22].mxu0 }
 0x8ab   : > { %v1161_v33 = vmax.f32 %v1156_v30, 0.0  ;;  %v1505_v34 = vpop.f32.mrb[23].mxu0 }
 0x8ad   : > { %v1162_v35 = vpack.c.bf16 %v1161_v33, %v1161_v33 }
 0x8af   : > { %1515 = vmatmul.mubr.msk.bf16.vlgmr.msra.gmra.mrb[20].mxu1 %vm1202_vm6, %v1162_v35 }
 0x982   : > { %v1240_v36 = vpop.f32.mrb[20].mxu1 }
 0x983   : > { %v1241_v37 = vadd.f32 %v1392_v0, %v1240_v36  ;;  %v1516_v38 = vpop.f32.mrb[21].mxu1 }
 0x984   : > { %v1243_v39 = vpop.f32.mrb[22].mxu1 }
 0x985   : > { %v1517_v40 = vpop.f32.mrb[23].mxu1  ;;  %v1246_v41 = vadd.f32 %v1241_v37, %v1093_v24 }
 0x987   : > { %v1249_v42 = vsel %vm470_vm1, %v1246_v41, 0.0 }
 0x988   : > { %1250 = vadd.xlane.f32.xlu1 %v1249_v42 }
 0xa15   : > { %v1251_v43 = vpop.xlane.xlu1 %1250 }
 0xa16   : > { %v1252_v44 = vmul.f32 0.03125, %v1251_v43 }
 0xa18   : > { %v1253_v45 = vsub.f32 %v1246_v41, %v1252_v44 }
 0xa1a   : > { %v1254_v46 = vmul.f32 %v1253_v45, %v1253_v45 }
 0xa1c   : > { %v1255_v47 = vsel %vm470_vm1, %v1254_v46, 0.0 }
 0xa1d   : > { %1256 = vadd.xlane.f32.xlu0 %v1255_v47 }
 0xaaa   : > { %v1257_v48 = vpop.xlane.xlu0 %1256 }
 0xaab   : > { %v1258_v49 = vmul.f32 0.03125, %v1257_v48 }
 0xaad   : > { %v1259_v50 = vadd.f32 1e-05, %v1258_v49 }
 0xaaf   : > { %1616 = vrsqrt.f32 %v1259_v50 }
 0xab9   : > { %v1617_v51 = vpop.eup %1616 }
 0xaba   : > { %v1261_v53 = vmul.f32 %v1617_v51, %v1253_v45 }
 0xabc   : > { %v1268_v55 = vmul.f32 %v1398_v52, %v1261_v53 }
 0xabe   : > { %v1275_v56 = vadd.f32 %v1399_v54, %v1268_v55 }
 0xac0   : > { %1276 = vst.msk [vmem:[%s446_s16] sm:$0xff] %vm470_vm1, %v1275_v56 }
 0xac1   : > { %1659 = shalt.err (!%p1656_p7)
}
 0xac2   : > { %s1660_s22 = scalar_lea.hbm %s2041_s0, 128  ;;  %s1664_s16 = scalar_lea.hbm %s2097_s13, 256 }
 0xac3   : > { %p1661_p8 = scmp.ne.s32.totalorder %s2041_s0, %s1660_s22  ;;  %p1665_p1 = scmp.lt.u32.totalorder %s2041_s0, %s2097_s13 }
 0xac4   : > { %p1666_p0 = scmp.lt.u32.totalorder %s1664_s16, %s1660_s22  ;;  %p1668_p6 = scmp.lt.u32.totalorder %s1660_s22, %s2041_s0 }
 0xac5   : > { %p1662_p11 = pnand %p1661_p8, %p2116_p9 }
 0xac6   : > { %p1667_p5 = por %p1666_p0, %p1665_p1 }
 0xac7   : > { %p1663_p13 = pneg %p1662_p11 }
 0xac8   : > { %p1669_p10 = por %p1668_p6, %p1667_p5 }
 0xaca   : > { %p1670_p12 = pnand %p1669_p10, %p1663_p13 }
 0xacc   : > { %1673 = shalt.err (!%p1670_p12)
}
 0xacd   : > { %1522 = dma.vmem_to_hbm [thread:$0]  (%p2116_p9), %s2043_s27, 128, %s2041_s0, %s1278_s15  }
 0xace PF: > { %p1534_p2 = scmp.ge.s32.totalorder %s1712_s28, 2  ;;  %s1303_s21 = sand.u32 1, %s1700_s25  }
 0xacf   : > { %p2117_p3 = scmp.ne.s32.totalorder %s2109_s19, 0  ;;  %s1304_s29 = scalar_lea.sflag [#allocation4], %s1303_s21 }
 0xad1   : > { %p1529_p4 = pnand %p1534_p2, %p2117_p3 }
 0xad3   : > { %1695 = dma.done.wait (!%p1529_p4), %s1304_s29, 128  }
 0xad4   : > { %1697 = vsyncadd (!%p1529_p4), %s1304_s29, 4294967168  ;;  %s2118_s28 = sld [smem:[#allocation9_spill]]  ;;  %s2119_s23 = sld [smem:[#allocation8_spill]] }
 0xad5   : > { %s2120_s27 = sld [smem:[#allocation10_spill]]  ;;  %s2121_s25 = smov %s1704_s26 }
 0xada   : > { %p24_p7 = scmp.ge.s32.totalorder %s2118_s28, 4   ;;  %s2122_s26 = smov %s2119_s23 }
 0xadc   :  { %26 = sbr.rel (!%p24_p7) target bundleno = 6 (0x6), region = 112 }
 0xae3   :  { %1309 = vsyncpa [#allocation3], 1 }
 0xae4   :  { %1311 = vsyncpa [#allocation3 + $0x1], 1 }
 0xae5   :  { %1312 = vsyncpa [#allocation4], 1 }
 0xae6   :  { %1314 = vsyncpa [#allocation4 + $0x1], 1 }

// kernel: tpu_custom_call.1
= control target key start
LH: loop header
LB: loop body
LE: loop exit
PB: predicated region body
PF: predicated region fallthrough
CT: control target
= control target key end

     0   :  { %s2084_s0 = inlined_call_operand.vmem [shape: f32[2,8,32], index: 0, kind: input, shape index: {}]   ;;  %s2085_s1 = inlined_call_operand.vmem [shape: bf16[32,96], index: 1, kind: input, shape index: {}]   ;;  %s2086_s2 = inlined_call_operand.vmem [shape: bf16[32,32], index: 2, kind: input, shape index: {}]   ;;  %s2087_s3 = inlined_call_operand.vmem [shape: f32[1,32], index: 3, kind: input, shape index: {}]   ;;  %s2088_s4 = inlined_call_operand.vmem [shape: f32[1,32], index: 4, kind: input, shape index: {}]   ;;  %s2089_s5 = inlined_call_operand.vmem [shape: f32[1,32], index: 5, kind: input, shape index: {}]   ;;  %s2090_s6 = inlined_call_operand.vmem [shape: f32[1,32], index: 6, kind: input, shape index: {}]   ;;  %s2091_s7 = inlined_call_operand.hbm [shape: bf16[32,64], index: 7, kind: input, shape index: {}]   ;;  %s2092_s8 = inlined_call_operand.vmem [shape: f32[1,64], index: 8, kind: input, shape index: {}]   ;;  %s2093_s9 = inlined_call_operand.vmem [shape: bf16[64,32], index: 9, kind: input, shape index: {}]   ;;  %s2094_s10 = inlined_call_operand.vmem [shape: f32[1,32], index: 10, kind: input, shape index: {}]   ;;  %s2095_s11 = inlined_call_operand.vmem [shape: f32[1,32], index: 11, kind: input, shape index: {}]   ;;  %s2096_s12 = inlined_call_operand.vmem [shape: f32[1,32], index: 12, kind: input, shape index: {}]   ;;  %s2097_s13 = inlined_call_operand.hbm [shape: f32[2,8,32], index: 13, kind: output, shape index: {}]  }
   0x1   :  { %2104 = sst [smem:[#allocation11_spill]] %s2084_s0 }
   0x2   :  { %18 = vsyncpa [#allocation3], 0 }
   0x3   :  { %19 = vsyncpa [#allocation4], 0 }
   0x4   :  { %21 = vsyncpa [#allocation4 + $0x1], 0  ;;  %s1804_s25 = smov 0   ;;  %s1806_s26 = smov 0  }
   0x5   :  { %s1808_s27 = smov 0   ;;  %s1810_s28 = smov 0  }
   0x6 LB: > { %2105 = sst [smem:[#allocation8_spill]] %s1708_s27  ;;  %s1825_s29 = sadd.s32 4294967295, %s1712_s28   ;;  %s1712_s28 = sphi %s1810_s28, %s2118_s28   ;;  %s1708_s27 = sphi %s1808_s27, %s2120_s27   ;;  %s1704_s26 = sphi %s1806_s26, %s2122_s26   ;;  %s1700_s25 = sphi %s1804_s25, %s2121_s25  }
   0x7   : > { %s1362_s30 = sadd.s32 4294967294, %s1712_s28   ;;  %s1829_s14 = sadd.s32 1, %s1712_s28  }
   0x8   : > { %2106 = sst [smem:[#allocation9_spill]] %s1829_s14  ;;  %s312_s15 = sadd.s32 1, %s1708_s27 }
   0x9   : > { %s309_s16 = ssub.s32 %s1712_s28, %s1829_s14  ;;  %p322_p0 = scmp.ne.s32.totalorder %s1708_s27, %s1704_s26 }
   0xa   : > { %p310_p1 = scmp.eq.s32.totalorder %s309_s16, 0  ;;  %p323_p2 = scmp.eq.s32.totalorder %s1825_s29, 1 }
   0xb   : > { %p328_p3 = scmp.ne.s32.totalorder %s1704_s26, %s1700_s25  ;;  %p329_p4 = scmp.eq.s32.totalorder %s1362_s30, 1 }
   0xc   : > { %s1840_s17 = scalar_select %p310_p1, %s1708_s27, %s312_s15  }
   0xd   : > { %p1842_p5 = por %p323_p2, %p322_p0  ;;  %p1846_p6 = por %p329_p4, %p328_p3 }
   0xe   : > { %2107 = sst [smem:[#allocation10_spill]] %s1840_s17  ;;  %p1363_p7 = scmp.ge.s32.totalorder %s1712_s28, 1 }
   0xf   : > { %s2108_s18 = scalar_select %p1842_p5, 1, 0 }
  0x10   : > { %s2109_s19 = scalar_select %p1846_p6, 1, 0 }
  0x11   : > { %p336_p8 = scmp.lt.s32.totalorder %s1712_s28, 3  ;;  %p2101_p9 = scmp.eq.s32.totalorder %s1825_s29, 0 }
  0x12   : > { %s1714_s21 = smov [#allocation2]   ;;  %s1618_s15 = scalar_lea.hbm %s2091_s7, 256 }
  0x13   : > { %p1853_p10 = pnand %p1363_p7, %p336_p8  ;;  %s366_s22 = sshll.u32 %s1714_s21, 4  ;;  %s367_s22 = int_to_ptr.vmem [resolvable:$true] %s366_s22 }
  0x14   : > { %p1619_p13 = scmp.ne.s32.totalorder %s2091_s7, %s1618_s15  ;;  %p1625_p3 = scmp.lt.u32.totalorder %s1618_s15, %s2091_s7 }
  0x15   : > { %s2110_s20 = scalar_select %p1853_p10, 1, 0 }
  0x16   : > { %p1524_p11 = pneg %p1853_p10 }
  0x18   : > { %p1861_p12 = pnand %p2101_p9, %p1524_p11 }
  0x1a   : > { %p1620_p0 = pneg %p1861_p12 }
  0x1c   : > { %p1621_p1 = pnand %p1620_p0, %p1619_p13 }
  0x1e   : > { %p1622_p2 = pneg %p1621_p1 }
  0x20   : > { %p1627_p4 = pnand %p1625_p3, %p1622_p2 }
  0x22   : > { %1630 = shalt.err (!%p1627_p4)
}
  0x23   : > { %s1631_s14 = scalar_lea.vmem %s367_s22, 256  ;;  %p1639_p9 = scmp.lt.s32.totalorder %s367_s22, %s367_s22 }
  0x24   : > { %p1632_p7 = scmp.ne.s32.totalorder %s367_s22, %s1631_s14  ;;  %p1640_p6 = scmp.lt.s32.totalorder %s1631_s14, %s1631_s14 }
  0x26   : > { %p1634_p8 = pnand %p1632_p7, %p1620_p0  ;;  %p1641_p5 = por %p1640_p6, %p1639_p9 }
  0x28   : > { %p1635_p11 = pneg %p1634_p8 }
  0x2a   : > { %p1642_p10 = pnand %p1641_p5, %p1635_p11 }
  0x2c   : > { %1645 = shalt.err (!%p1642_p10)
}
  0x2d   : > { %s1715_s17 = smov 64   ;;  %s1716_s24 = smov 4  }
  0x2e   : > { %1527 = dma.hbm_to_vmem [thread:$0]  (!%p1861_p12), %s2091_s7, 256, %s367_s22, [#allocation3], %s1715_s17, %s1715_s17, %s1716_s24  }
  0x2f   : > { %p2112_p13 = scmp.ne.s32.totalorder %s2110_s20, 0 }
  0x30   : > { %p2113_p1 = scmp.eq.s32.totalorder (!%p2112_p13), %s1825_s29, 0 }
  0x31   : > { %404 = sbr.rel (%p2112_p13) target bundleno = 2766 (0xace), region = 72 }
  0x38   : > { %1691 = dma.done.wait (%p2113_p1), [#allocation3], 256   ;;  %p2114_p0 = pmov %p2113_p1 }
  0x39   : > { %p447_p5 = scmp.lt.s32.totalorder %s1825_s29, 1  ;;  %v1717_v0 = vmov 0.0   ;;  %vm1718_vm0 = vmmov 0   ;;  %s2115_s0 = sld [smem:[#allocation11_spill]]  ;;  %v1586_v1 = vld [vmem:[%s2085_s1] sm:$0xff]   ;;  %v1587_v2 = vld [vmem:[%s2085_s1 + $0x8] sm:$0xff]  }
  0x3a   : > { %1693 = vsyncadd (%p2114_p0), [#allocation3], 4294967040  ;;  %1434 = vmatprep.subr.bf16.mxu0 %v1717_v0  ;;  %1438 = vmatprep.mubr.msk.bf16.mxu0 %vm1718_vm0, %v1717_v0  ;;  %vm470_vm1 = vcmask 261120   ;;  %s1719_s30 = smov 120   ;;  %s1720_s16 = smov 96   ;;  %vm518_vm2 = vcmask 64512  }
  0x3b   : > { %s448_s27 = scalar_select %p447_p5, %s1825_s29, 1  ;;  %1442 = vmatprep.subr.bf16.mxu1 %v1717_v0  ;;  %1444 = vmatprep.mubr.msk.bf16.mxu1 %vm1718_vm0, %v1717_v0  ;;  %vm580_vm3 = vcmask 1043456   ;;  %vm969_vm4 = vcmask 130048   ;;  %vm971_vm5 = vcmask 195584   ;;  %vm1202_vm6 = vcmask 523264  }
  0x3c   : > { %1435 = vmatpush3.bf16.msra.mxu0 %v1586_v1  ;;  %s1723_s20 = smov 72   ;;  %s1724_s22 = smov 112  }
  0x3d   : > { %s1369_s14 = sshll.u32 %s448_s27, 3  ;;  %1436 = vmatprep.subr.bf16.mxu0 %v1717_v0  ;;  %s1721_s27 = smov 80  }
  0x3e   : > { %s1726_s15 = smov 56   ;;  %s1727_s21 = smov 64  }
  0x3f   : > { %s450_s23 = scalar_lea.vmem %s2115_s0, %s1369_s14  ;;  %s1722_s14 = smov 88  }
  0x40   : > { %v1904_v3 = vld [vmem:[%s450_s23] sm:$0xff]  ;;  %1437 = vmatpush3.bf16.msra.mxu0 %v1587_v2  ;;  %s1725_s23 = smov 104   ;;  %s1728_s17 = smov 40  }
  0x41   : > { %v453_v4 = vpack.c.bf16 %v1904_v3, %v1904_v3  ;;  %1448 = vmatprep.subr.bf16.mxu0 %v1717_v0  ;;  %s1729_s24 = smov 48   ;;  %p2116_p9 = scmp.ne.s32.totalorder %s2108_s18, 0 }
  0x43   : > { %1439 = vmatmul.mubr.msk.bf16.vlgmr.msra.gmra.mrb[0].mxu0 %vm470_vm1, %v453_v4 }
  0x44   : > { %1450 = vmatprep.mubr.msk.bf16.mxu0 %vm1718_vm0, %v1717_v0 }
 0x116   : > { %v508_v5 = vpop.f32.mrb[0].mxu0 }
 0x117   : > { %v1913_v6 = vpack.c.bf16 %v508_v5, %v508_v5  ;;  %v1440_v7 = vpop.f32.mrb[1].mxu0 }
 0x118   : > { %v511_v8 = vpop.f32.mrb[2].mxu0 }
 0x119   : > { %626 = vrot.lane.b32.xlu1 %v1913_v6, %s1719_s30  ;;  %516 = vrot.lane.b32.xlu0 %v1913_v6, %s1720_s16  ;;  %v1441_v9 = vpop.f32.mrb[3].mxu0  ;;  %s1730_s30 = smov 8  }
 0x11d   : > { %738 = vrot.lane.b32.xlu1 %v1913_v6, %s1721_s27  ;;  %628 = vrot.lane.b32.xlu0 %v1913_v6, %s1722_s14 }
 0x121   : > { %848 = vrot.lane.b32.xlu1 %v1913_v6, %s1723_s20  ;;  %736 = vrot.lane.b32.xlu0 %v1913_v6, %s1724_s22  ;;  %s1731_s22 = smov 16  }
 0x125   : > { %846 = vrot.lane.b32.xlu0 %v1913_v6, %s1725_s23  ;;  %s1732_s23 = smov 24  }
 0x18b   : > { %v517_v10 = vpop.permute.xlu0 %516  ;;  %v627_v13 = vpop.permute.xlu1 %626 }
 0x18c   : > { %v523_v11 = vsel %vm518_vm2, %v517_v10, 0 }
 0x18d   : > { %1443 = vmatpush3.bf16.xpose.msra.mxu1 %v523_v11 }
 0x18e   : > { %1454 = vmatprep.subr.bf16.mxu1 %v1717_v0 }
 0x18f   : > { %v629_v12 = vpop.permute.xlu0 %628  ;;  %v739_v15 = vpop.permute.xlu1 %738 }
 0x190   : > { %v634_v14 = vsel %vm518_vm2, %v629_v12, 0  ;;  %v744_v16 = vsel %vm518_vm2, %v739_v15, 0 }
 0x193   : > { %v849_v17 = vpop.permute.xlu1 %848  ;;  %v737_v18 = vpop.permute.xlu0 %736 }
 0x194   : > { %1445 = vmatmul.mubr.msk.bf16.vlgmr.msra.gmra.mrb[0].mxu1 %vm518_vm2, %v1913_v6  ;;  %v854_v19 = vsel %vm518_vm2, %v849_v17, 0 }
 0x195   : > { %1455 = vmatpush3.bf16.xpose.msra.mxu1 %v634_v14  ;;  %1456 = vmatprep.mubr.msk.bf16.mxu1 %vm1718_vm0, %v1717_v0 }
 0x196   : > { %1466 = vmatprep.subr.bf16.mxu1 %v1717_v0 }
 0x197   : > { %v847_v20 = vpop.permute.xlu0 %846 }
 0x19c   : > { %1457 = vmatmul.mubr.msk.bf16.vlgmr.msra.gmra.mrb[4].mxu1 %vm518_vm2, %v627_v13 }
 0x19d   : > { %1467 = vmatpush3.bf16.xpose.msra.mxu1 %v744_v16  ;;  %1468 = vmatprep.mubr.msk.bf16.mxu1 %vm1718_vm0, %v1717_v0 }
 0x19e   : > { %1478 = vmatprep.subr.bf16.mxu1 %v1717_v0 }
 0x1a4   : > { %1469 = vmatmul.mubr.msk.bf16.vlgmr.msra.gmra.mrb[8].mxu1 %vm518_vm2, %v737_v18 }
 0x1a5   : > { %1479 = vmatpush3.bf16.xpose.msra.mxu1 %v854_v19  ;;  %1480 = vmatprep.mubr.msk.bf16.mxu1 %vm1718_vm0, %v1717_v0 }
 0x1a6   : > { %1490 = vmatprep.subr.bf16.mxu1 %v1717_v0 }
 0x1ac   : > { %1481 = vmatmul.mubr.msk.bf16.vlgmr.msra.gmra.mrb[12].mxu1 %vm518_vm2, %v847_v20 }
 0x1ad   : > { %1494 = vmatprep.mubr.msk.bf16.mxu1 %vm1718_vm0, %v1717_v0 }
 0x267   : > { %v559_v21 = vpop.f32.mrb[0].mxu1 }
 0x268   : > { %v1446_v22 = vpop.f32.mrb[1].mxu1  ;;  %v565_v23 = vsel %vm518_vm2, %v559_v21, -inf }
 0x269   : > { %566 = vmax.xlane.f32.xlu1 %v565_v23  ;;  %v562_v24 = vpop.f32.mrb[2].mxu1  ;;  %v1588_v23 = vld [vmem:[%s2086_s2] sm:$0xff]  }
 0x26a   : > { %v1447_v25 = vpop.f32.mrb[3].mxu1  ;;  %1491 = vmatpush3.bf16.msra.mxu1 %v1588_v23 }
 0x26b   : > { %1492 = vmatprep.subr.bf16.mxu1 %v1717_v0  ;;  %v1589_v25 = vld [vmem:[%s2086_s2 + $0x8] sm:$0xff]  }
 0x26e   : > { %1493 = vmatpush3.bf16.msra.mxu1 %v1589_v25 }
 0x26f   : > { %v670_v26 = vpop.f32.mrb[4].mxu1  ;;  %1506 = vmatprep.subr.bf16.mxu1 %v1717_v0 }
 0x270   : > { %v1458_v27 = vpop.f32.mrb[5].mxu1  ;;  %v676_v28 = vsel %vm518_vm2, %v670_v26, -inf }
 0x271   : > { %677 = vmax.xlane.f32.xlu0 %v676_v28  ;;  %v673_v29 = vpop.f32.mrb[6].mxu1 }
 0x272   : > { %v1459_v30 = vpop.f32.mrb[7].mxu1 }
 0x277   : > { %v780_v31 = vpop.f32.mrb[8].mxu1 }
 0x278   : > { %v1470_v32 = vpop.f32.mrb[9].mxu1  ;;  %v786_v33 = vsel %vm518_vm2, %v780_v31, -inf }
 0x279   : > { %787 = vmax.xlane.f32.xlu0 %v786_v33  ;;  %v783_v34 = vpop.f32.mrb[10].mxu1 }
 0x27a   : > { %686 = vrot.lane.b32.xlu1 %v1913_v6, %s1726_s15  ;;  %v1471_v35 = vpop.f32.mrb[11].mxu1 }
 0x27f   : > { %v890_v36 = vpop.f32.mrb[12].mxu1 }
 0x280   : > { %v1482_v37 = vpop.f32.mrb[13].mxu1  ;;  %v896_v40 = vsel %vm518_vm2, %v890_v36, -inf }
 0x281   : > { %v893_v38 = vpop.f32.mrb[14].mxu1 }
 0x282   : > { %v1483_v39 = vpop.f32.mrb[15].mxu1 }
 0x28f   : > { %575 = vrot.lane.b32.xlu0 %v1913_v6, %s1727_s21 }
 0x293   : > { %906 = vrot.lane.b32.xlu0 %v1913_v6, %s1728_s17 }
 0x29e   : > { %897 = vmax.xlane.f32.xlu1 %v896_v40 }
 0x2af   : > { %796 = vrot.lane.b32.xlu1 %v1913_v6, %s1729_s24 }
 0x2f6   : > { %v567_v41 = vpop.xlane.xlu1 %566 }
 0x2f7   : > { %v568_v42 = vsub.f32 %v559_v21, %v567_v41 }
 0x2f9   : > { %v569_v43 = vmul.f32 1.442695, %v568_v42 }
 0x2fa   : > { %v687_v53 = vpop.permute.xlu1 %686 }
 0x2fb   : > { %1596 = vpow2.f32 %v569_v43  ;;  %v692_v57 = vsel %vm580_vm3, %v687_v53, 0 }
 0x2fe   : > { %v678_v44 = vpop.xlane.xlu0 %677 }
 0x2ff   : > { %v679_v45 = vsub.f32 %v670_v26, %v678_v44 }
 0x301   : > { %v680_v46 = vmul.f32 1.442695, %v679_v45 }
 0x303   : > { %1598 = vpow2.f32 %v680_v46 }
 0x305   : > { %v1597_v50 = vpop.eup %1596 }
 0x306   : > { %v788_v47 = vpop.xlane.xlu0 %787  ;;  %v574_v55 = vpack.c.bf16 %v1597_v50, %v1597_v50  ;;  %v571_v58 = vsel %vm518_vm2, %v1597_v50, 0.0 }
 0x307   : > { %v789_v48 = vsub.f32 %v780_v31, %v788_v47 }
 0x309   : > { %v790_v49 = vmul.f32 1.442695, %v789_v48 }
 0x30a   : > { %v576_v51 = vpop.permute.xlu0 %575 }
 0x30b   : > { %1600 = vpow2.f32 %v790_v49  ;;  %v582_v52 = vsel %vm580_vm3, %v576_v51, 0 }
 0x30c   : > { %1449 = vmatpush3.bf16.msra.mxu0 %v582_v52 }
 0x30d   : > { %v1599_v54 = vpop.eup %1598  ;;  %1460 = vmatprep.subr.bf16.mxu0 %v1717_v0 }
 0x30e   : > { %v682_v56 = vsel %vm518_vm2, %v1599_v54, 0.0  ;;  %v685_v60 = vpack.c.bf16 %v1599_v54, %v1599_v54  ;;  %v907_v5 = vpop.permute.xlu0 %906 }
 0x30f   : > { %683 = vadd.xlane.f32.xlu1 %v682_v56  ;;  %1451 = vmatmul.mubr.msk.bf16.vlgmr.msra.gmra.mrb[4].mxu0 %vm518_vm2, %v574_v55  ;;  %v912_v7 = vsel %vm580_vm3, %v907_v5, 0 }
 0x310   : > { %1461 = vmatpush3.bf16.msra.mxu0 %v692_v57  ;;  %1462 = vmatprep.mubr.msk.bf16.mxu0 %vm1718_vm0, %v1717_v0 }
 0x311   : > { %1472 = vmatprep.subr.bf16.mxu0 %v1717_v0 }
 0x313   : > { %572 = vadd.xlane.f32.xlu1 %v571_v58 }
 0x315   : > { %v1601_v59 = vpop.eup %1600 }
 0x316   : > { %v792_v61 = vsel %vm518_vm2, %v1601_v59, 0.0  ;;  %v795_v6 = vpack.c.bf16 %v1601_v59, %v1601_v59 }
 0x317   : > { %793 = vadd.xlane.f32.xlu0 %v792_v61  ;;  %1463 = vmatmul.mubr.msk.bf16.vlgmr.msra.gmra.mrb[8].mxu0 %vm518_vm2, %v685_v60 }
 0x318   : > { %1474 = vmatprep.mubr.msk.bf16.mxu0 %vm1718_vm0, %v1717_v0 }
 0x32b   : > { %v898_v62 = vpop.xlane.xlu1 %897 }
 0x32c   : > { %v899_v63 = vsub.f32 %v890_v36, %v898_v62 }
 0x32e   : > { %v900_v1 = vmul.f32 1.442695, %v899_v63  ;;  %v1384_v63 = vld [vmem:[%s2087_s3] ss:$0 sm:$0xff] }
 0x32f   : > { %v797_v2 = vpop.permute.xlu1 %796 }
 0x330   : > { %1602 = vpow2.f32 %v900_v1  ;;  %v802_v4 = vsel %vm580_vm3, %v797_v2, 0  ;;  %v1385_v2 = vld [vmem:[%s2088_s4] ss:$0 sm:$0xff] }
 0x331   : > { %1473 = vmatpush3.bf16.msra.mxu0 %v802_v4 }
 0x332   : > { %1484 = vmatprep.subr.bf16.mxu0 %v1717_v0 }
 0x334   : > { %1475 = vmatmul.mubr.msk.bf16.vlgmr.msra.gmra.mrb[12].mxu0 %vm518_vm2, %v795_v6 }
 0x335   : > { %1485 = vmatpush3.bf16.msra.mxu0 %v912_v7  ;;  %1486 = vmatprep.mubr.msk.bf16.mxu0 %vm1718_vm0, %v1717_v0 }
 0x336   : > { %1498 = vmatprep.subr.bf16.mxu0 %v1717_v0 }
 0x33a   : > { %v1603_v8 = vpop.eup %1602 }
 0x33b   : > { %v902_v9 = vsel %vm518_vm2, %v1603_v8, 0.0  ;;  %v905_v10 = vpack.c.bf16 %v1603_v8, %v1603_v8 }
 0x33c   : > { %903 = vadd.xlane.f32.xlu0 %v902_v9 }
 0x33d   : > { %1487 = vmatmul.mubr.msk.bf16.vlgmr.msra.gmra.mrb[16].mxu0 %vm518_vm2, %v905_v10 }
 0x33e   : > { %1502 = vmatprep.mubr.msk.bf16.mxu0 %vm1718_vm0, %v1717_v0 }
 0x39c   : > { %v684_v11 = vpop.xlane.xlu1 %683 }
 0x39d   : > { %1604 = vrcp.f32 %v684_v11 }
 0x3a0   : > { %v573_v38 = vpop.xlane.xlu1 %572 }
 0x3a4   : > { %v794_v22 = vpop.xlane.xlu0 %793 }
 0x3a5   : > { %1606 = vrcp.f32 %v794_v22  ;;  %v1387_v22 = vld [vmem:[%s2090_s6] ss:$0 sm:$0xff] }
 0x3a7   : > { %v1605_v16 = vpop.eup %1604 }
 0x3af   : > { %v1607_v26 = vpop.eup %1606 }
 0x3c9   : > { %v904_v24 = vpop.xlane.xlu0 %903 }
 0x3ca   : > { %1608 = vrcp.f32 %v904_v24 }
 0x3cb   : > { %1610 = vrcp.f32 %v573_v38 }
 0x3d4   : > { %v1609_v32 = vpop.eup %1608 }
 0x3d5   : > { %v1611_v39 = vpop.eup %1610 }
 0x3e2   : > { %v618_v12 = vpop.f32.mrb[4].mxu0 }
 0x3e3   : > { %v1452_v13 = vpop.f32.mrb[5].mxu0  ;;  %v625_v42 = vmul.f32 %v1611_v39, %v618_v12 }
 0x3e4   : > { %v621_v14 = vpop.f32.mrb[6].mxu0  ;;  %v1590_v13 = vld [vmem:[#allocation2] sm:$0xff]  }
 0x3e5   : > { %v1453_v15 = vpop.f32.mrb[7].mxu0  ;;  %1499 = vmatpush3.bf16.msra.mxu0 %v1590_v13  ;;  %v1591_v14 = vld [vmem:[#allocation2 + $0x8] sm:$0xff]  }
 0x3e6   : > { %1500 = vmatprep.subr.bf16.mxu0 %v1717_v0  ;;  %v1593_v15 = vld [vmem:[%s2093_s9 + $0x8] sm:$0xff]  }
 0x3e9   : > { %1501 = vmatpush3.bf16.msra.mxu0 %v1591_v14 }
 0x3ea   : > { %v728_v17 = vpop.f32.mrb[8].mxu0 }
 0x3eb   : > { %v735_v18 = vmul.f32 %v1605_v16, %v728_v17  ;;  %v1464_v19 = vpop.f32.mrb[9].mxu0 }
 0x3ec   : > { %v731_v20 = vpop.f32.mrb[10].mxu0 }
 0x3ed   : > { %957 = vrot.lane.b32.xlu0 %v735_v18, %s1730_s30  ;;  %v1465_v21 = vpop.f32.mrb[11].mxu0  ;;  %v1386_v20 = vld [vmem:[%s2089_s5] ss:$0 sm:$0xff]  ;;  %s1401_s30 = sshll.u32 %s1825_s29, 7  ;;  %s1733_s29 = smov [#allocation5]  }
 0x3ee   : > { %s2041_s0 = scalar_lea.hbm %s2097_s13, %s1401_s30 }
 0x407   : > { %v838_v27 = vpop.f32.mrb[12].mxu0 }
 0x408   : > { %v845_v28 = vmul.f32 %v1607_v26, %v838_v27  ;;  %v1476_v29 = vpop.f32.mrb[13].mxu0  ;;  %v1594_v26 = vld [vmem:[%s2093_s9 + $0x10] sm:$0xff]   ;;  %v1595_v27 = vld [vmem:[%s2093_s9 + $0x18] sm:$0xff]  }
 0x409   : > { %v841_v30 = vpop.f32.mrb[14].mxu0 }
 0x40a   : > { %961 = vrot.lane.b32.xlu1 %v845_v28, %s1731_s22  ;;  %v1477_v31 = vpop.f32.mrb[15].mxu0  ;;  %v1388_v28 = vld [vmem:[%s2092_s8] ss:$0 sm:$0xff]  ;;  %s444_s22 = sand.u32 1, %s1704_s26  }
 0x40b   : > { %s1278_s15 = scalar_lea.sflag [#allocation4], %s444_s22 }
 0x410   : > { %v948_v33 = vpop.f32.mrb[16].mxu0 }
 0x411   : > { %v955_v34 = vmul.f32 %v1609_v32, %v948_v33  ;;  %v1488_v35 = vpop.f32.mrb[17].mxu0 }
 0x412   : > { %v951_v36 = vpop.f32.mrb[18].mxu0 }
 0x413   : > { %965 = vrot.lane.b32.xlu1 %v955_v34, %s1732_s23  ;;  %v1489_v37 = vpop.f32.mrb[19].mxu0  ;;  %s1368_s23 = sshll.u32 %s444_s22, 3 }
 0x414   : > { %s446_s16 = scalar_lea.vmem [#allocation5], %s1368_s23  ;;  %s1650_s23 = sshll.u32 %s1733_s29, 4  ;;  %s1651_s23 = int_to_ptr.vmem [resolvable:$false] %s1650_s23 }
 0x415   : > { %s1291_s27 = sshll.u32 %s446_s16, 4  ;;  %s1652_s17 = scalar_lea.vmem %s1651_s23, 256  ;;  %s2043_s27 = int_to_ptr.vmem [resolvable:$true] %s1291_s27 }
 0x416   : > { %s1646_s21 = scalar_lea.vmem %s2043_s27, 128  ;;  %p1653_p2 = scmp.lt.s32.totalorder %s2043_s27, %s1651_s23 }
 0x417   : > { %p1647_p6 = scmp.ne.s32.totalorder %s2043_s27, %s1646_s21  ;;  %p1654_p3 = scmp.lt.s32.totalorder %s1652_s17, %s1646_s21 }
 0x419   : > { %p1648_p10 = pnand %p1647_p6, %p2116_p9  ;;  %p1655_p4 = por %p1654_p3, %p1653_p2 }
 0x41b   : > { %p1649_p12 = pneg %p1648_p10 }
 0x41d   : > { %p1656_p7 = pnand %p1655_p4, %p1649_p12 }
 0x45f   : > { %v958_v40 = vpop.permute.xlu0 %957 }
 0x460   : > { %v968_v43 = vsel %vm518_vm2, %v625_v42, %v958_v40 }
 0x47c   : > { %v962_v41 = vpop.permute.xlu1 %961 }
 0x47d   : > { %v970_v44 = vsel %vm969_vm4, %v968_v43, %v962_v41 }
 0x485   : > { %v966_v45 = vpop.permute.xlu1 %965 }
 0x486   : > { %v972_v46 = vsel %vm971_vm5, %v970_v44, %v966_v45 }
 0x487   : > { %v973_v47 = vpack.c.bf16 %v972_v46, %v972_v46 }
 0x489   : > { %1495 = vmatmul.mubr.msk.bf16.vlgmr.msra.gmra.mrb[16].mxu1 %vm470_vm1, %v973_v47 }
 0x48a   : > { %1514 = vmatprep.mubr.msk.bf16.mxu1 %vm1718_vm0, %v1717_v0 }
 0x55c   : > { %v1027_v48 = vpop.f32.mrb[16].mxu1 }
 0x55d   : > { %v1033_v49 = vadd.f32 %v1027_v48, %v1904_v3  ;;  %v1496_v50 = vpop.f32.mrb[17].mxu1 }
 0x55e   : > { %v1030_v51 = vpop.f32.mrb[18].mxu1 }
 0x55f   : > { %v1497_v52 = vpop.f32.mrb[19].mxu1  ;;  %v1036_v53 = vsel %vm470_vm1, %v1033_v49, 0.0 }
 0x560   : > { %1037 = vadd.xlane.f32.xlu0 %v1036_v53  ;;  %v1398_v52 = vld [vmem:[%s2095_s11] ss:$0 sm:$0xff] }
 0x5ed   : > { %v1038_v54 = vpop.xlane.xlu0 %1037 }
 0x5ee   : > { %v1040_v55 = vmul.f32 0.03125, %v1038_v54  ;;  %v1399_v54 = vld [vmem:[%s2096_s12] ss:$0 sm:$0xff] }
 0x5f0   : > { %v1041_v56 = vsub.f32 %v1033_v49, %v1040_v55 }
 0x5f2   : > { %v1042_v57 = vmul.f32 %v1041_v56, %v1041_v56 }
 0x5f4   : > { %v1043_v58 = vsel %vm470_vm1, %v1042_v57, 0.0 }
 0x5f5   : > { %1044 = vadd.xlane.f32.xlu1 %v1043_v58 }
 0x682   : > { %v1045_v59 = vpop.xlane.xlu1 %1044 }
 0x683   : > { %v1046_v60 = vmul.f32 0.03125, %v1045_v59 }
 0x685   : > { %v1047_v61 = vadd.f32 1e-06, %v1046_v60 }
 0x687   : > { %1612 = vrsqrt.f32 %v1047_v61 }
 0x691   : > { %v1613_v62 = vpop.eup %1612 }
 0x692   : > { %v1049_v1 = vmul.f32 %v1613_v62, %v1041_v56 }
 0x694   : > { %v1056_v4 = vmul.f32 %v1384_v63, %v1049_v1 }
 0x696   : > { %v1063_v5 = vadd.f32 %v1385_v2, %v1056_v4 }
 0x698   : > { %v1064_v6 = vadd.f32 %v1063_v5, %v1904_v3  ;;  %v1592_v3 = vld [vmem:[%s2093_s9] sm:$0xff]  }
 0x699   : > { %1507 = vmatpush3.bf16.msra.mxu1 %v1592_v3 }
 0x69a   : > { %v1067_v7 = vsel %vm470_vm1, %v1064_v6, 0.0  ;;  %1508 = vmatprep.subr.bf16.mxu1 %v1717_v0 }
 0x69b   : > { %1068 = vadd.xlane.f32.xlu0 %v1067_v7 }
 0x69d   : > { %1509 = vmatpush3.bf16.msra.mxu1 %v1593_v15 }
 0x69e   : > { %1510 = vmatprep.subr.bf16.mxu1 %v1717_v0 }
 0x6a1   : > { %1511 = vmatpush3.bf16.msra.mxu1 %v1594_v26 }
 0x6a2   : > { %1512 = vmatprep.subr.bf16.mxu1 %v1717_v0  ;;  %v1392_v0 = vld [vmem:[%s2094_s10] ss:$0 sm:$0xff] }
 0x6a5   : > { %1513 = vmatpush3.bf16.msra.mxu1 %v1595_v27 }
 0x728   : > { %v1069_v8 = vpop.xlane.xlu0 %1068 }
 0x729   : > { %v1070_v9 = vmul.f32 0.03125, %v1069_v8 }
 0x72b   : > { %v1071_v10 = vsub.f32 %v1064_v6, %v1070_v9 }
 0x72d   : > { %v1072_v11 = vmul.f32 %v1071_v10, %v1071_v10 }
 0x72f   : > { %v1073_v12 = vsel %vm470_vm1, %v1072_v11, 0.0 }
 0x730   : > { %1074 = vadd.xlane.f32.xlu0 %v1073_v12 }
 0x7bd   : > { %v1075_v16 = vpop.xlane.xlu0 %1074 }
 0x7be   : > { %v1076_v17 = vmul.f32 0.03125, %v1075_v16 }
 0x7c0   : > { %v1077_v18 = vadd.f32 1e-05, %v1076_v17 }
 0x7c2   : > { %1614 = vrsqrt.f32 %v1077_v18 }
 0x7cc   : > { %v1615_v19 = vpop.eup %1614 }
 0x7cd   : > { %v1079_v21 = vmul.f32 %v1615_v19, %v1071_v10 }
 0x7cf   : > { %v1086_v23 = vmul.f32 %v1386_v20, %v1079_v21 }
 0x7d1   : > { %v1093_v24 = vadd.f32 %v1387_v22, %v1086_v23 }
 0x7d3   : > { %v1094_v25 = vpack.c.bf16 %v1093_v24, %v1093_v24 }
 0x7d5   : > { %1503 = vmatmul.mubr.msk.bf16.vlgmr.msra.gmra.mrb[20].mxu0 %vm470_vm1, %v1094_v25 }
 0x8a8   : > { %v1155_v29 = vpop.f32.mrb[20].mxu0 }
 0x8a9   : > { %v1156_v30 = vadd.f32 %v1388_v28, %v1155_v29  ;;  %v1504_v31 = vpop.f32.mrb[21].mxu0 }
 0x8aa   : > { %v1158_v32 = vpop.f32.mrb[22].mxu0 }
 0x8ab   : > { %v1161_v33 = vmax.f32 %v1156_v30, 0.0  ;;  %v1505_v34 = vpop.f32.mrb[23].mxu0 }
 0x8ad   : > { %v1162_v35 = vpack.c.bf16 %v1161_v33, %v1161_v33 }
 0x8af   : > { %1515 = vmatmul.mubr.msk.bf16.vlgmr.msra.gmra.mrb[20].mxu1 %vm1202_vm6, %v1162_v35 }
 0x982   : > { %v1240_v36 = vpop.f32.mrb[20].mxu1 }
 0x983   : > { %v1241_v37 = vadd.f32 %v1392_v0, %v1240_v36  ;;  %v1516_v38 = vpop.f32.mrb[21].mxu1 }
 0x984   : > { %v1243_v39 = vpop.f32.mrb[22].mxu1 }
 0x985   : > { %v1517_v40 = vpop.f32.mrb[23].mxu1  ;;  %v1246_v41 = vadd.f32 %v1241_v37, %v1093_v24 }
 0x987   : > { %v1249_v42 = vsel %vm470_vm1, %v1246_v41, 0.0 }
 0x988   : > { %1250 = vadd.xlane.f32.xlu1 %v1249_v42 }
 0xa15   : > { %v1251_v43 = vpop.xlane.xlu1 %1250 }
 0xa16   : > { %v1252_v44 = vmul.f32 0.03125, %v1251_v43 }
 0xa18   : > { %v1253_v45 = vsub.f32 %v1246_v41, %v1252_v44 }
 0xa1a   : > { %v1254_v46 = vmul.f32 %v1253_v45, %v1253_v45 }
 0xa1c   : > { %v1255_v47 = vsel %vm470_vm1, %v1254_v46, 0.0 }
 0xa1d   : > { %1256 = vadd.xlane.f32.xlu0 %v1255_v47 }
 0xaaa   : > { %v1257_v48 = vpop.xlane.xlu0 %1256 }
 0xaab   : > { %v1258_v49 = vmul.f32 0.03125, %v1257_v48 }
 0xaad   : > { %v1259_v50 = vadd.f32 1e-05, %v1258_v49 }
 0xaaf   : > { %1616 = vrsqrt.f32 %v1259_v50 }
 0xab9   : > { %v1617_v51 = vpop.eup %1616 }
 0xaba   : > { %v1261_v53 = vmul.f32 %v1617_v51, %v1253_v45 }
 0xabc   : > { %v1268_v55 = vmul.f32 %v1398_v52, %v1261_v53 }
 0xabe   : > { %v1275_v56 = vadd.f32 %v1399_v54, %v1268_v55 }
 0xac0   : > { %1276 = vst.msk [vmem:[%s446_s16] sm:$0xff] %vm470_vm1, %v1275_v56 }
 0xac1   : > { %1659 = shalt.err (!%p1656_p7)
}
 0xac2   : > { %s1660_s22 = scalar_lea.hbm %s2041_s0, 128  ;;  %s1664_s16 = scalar_lea.hbm %s2097_s13, 256 }
 0xac3   : > { %p1661_p8 = scmp.ne.s32.totalorder %s2041_s0, %s1660_s22  ;;  %p1665_p1 = scmp.lt.u32.totalorder %s2041_s0, %s2097_s13 }
 0xac4   : > { %p1666_p0 = scmp.lt.u32.totalorder %s1664_s16, %s1660_s22  ;;  %p1668_p6 = scmp.lt.u32.totalorder %s1660_s22, %s2041_s0 }
 0xac5   : > { %p1662_p11 = pnand %p1661_p8, %p2116_p9 }
 0xac6   : > { %p1667_p5 = por %p1666_p0, %p1665_p1 }
 0xac7   : > { %p1663_p13 = pneg %p1662_p11 }
 0xac8   : > { %p1669_p10 = por %p1668_p6, %p1667_p5 }
 0xaca   : > { %p1670_p12 = pnand %p1669_p10, %p1663_p13 }
 0xacc   : > { %1673 = shalt.err (!%p1670_p12)
}
 0xacd   : > { %1522 = dma.vmem_to_hbm [thread:$0]  (%p2116_p9), %s2043_s27, 128, %s2041_s0, %s1278_s15  }
 0xace PF: > { %p1534_p2 = scmp.ge.s32.totalorder %s1712_s28, 2  ;;  %s1303_s21 = sand.u32 1, %s1700_s25  }
 0xacf   : > { %p2117_p3 = scmp.ne.s32.totalorder %s2109_s19, 0  ;;  %s1304_s29 = scalar_lea.sflag [#allocation4], %s1303_s21 }
 0xad1   : > { %p1529_p4 = pnand %p1534_p2, %p2117_p3 }
 0xad3   : > { %1695 = dma.done.wait (!%p1529_p4), %s1304_s29, 128  }
 0xad4   : > { %1697 = vsyncadd (!%p1529_p4), %s1304_s29, 4294967168  ;;  %s2118_s28 = sld [smem:[#allocation9_spill]]  ;;  %s2119_s23 = sld [smem:[#allocation8_spill]] }
 0xad5   : > { %s2120_s27 = sld [smem:[#allocation10_spill]]  ;;  %s2121_s25 = smov %s1704_s26 }
 0xada   : > { %p24_p7 = scmp.ge.s32.totalorder %s2118_s28, 4   ;;  %s2122_s26 = smov %s2119_s23 }
 0xadc   :  { %26 = sbr.rel (!%p24_p7) target bundleno = 6 (0x6), region = 112 }
 0xae3   :  { %1309 = vsyncpa [#allocation3], 1 }
 0xae4   :  { %1311 = vsyncpa [#allocation3 + $0x1], 1 }
 0xae5   :  { %1312 = vsyncpa [#allocation4], 1 }
 0xae6   :  { %1314 = vsyncpa [#allocation4 + $0x1], 1 }

</bundles_post_ra>
